<compile_context>
chip_gen: v7x
topology: tpu7x:2x2x1
jax: 0.10.0
libtpu: 0.0.40
codegen_flags: <defaults>
</compile_context>

<pallas_src>
import functools

import jax
import jax.numpy as jnp
import numpy as np
from jax.experimental import pallas as pl
from jax.experimental.pallas import tpu as pltpu

_PAD0 = 128  # lane offset of the activation inside its zero-padded scratch


def _conv_relu_pool(x, wk, mask_ref, sel_ref, nb, H, W,
                    xpad_ref, cols_ref, ypad_ref):
    """One Conv(3x3, pad=1, no bias) + ReLU + MaxPool(2,2) on VMEM data.

    x    : (Cin_p, nb*H*W) f32    channels in sublanes, raster pixels in lanes
    wk   : (Cout, 9*Cin_p) f32    contraction dim ordered as (tap, channel)
    mask : (9*Cin_p, nb*H*W) f32  0/1 row-boundary validity (host constant)
    sel  : (nb*H*W, nb*(H//2)*(W//2)) f32 one-hot pool compaction (host const)
    returns (Cout, nb*(H//2)*(W//2)) f32
    """
    cin_p = xpad_ref.shape[0]
    NP = nb * H * W

    # ---- stage activation into a zero-padded lane buffer (aligned store) ----
    xpad_ref[...] = jnp.zeros(xpad_ref.shape, xpad_ref.dtype)
    xpad_ref[:, _PAD0:_PAD0 + NP] = x

    # ---- im2col: 9 taps folded into the contraction dim.  Row wrap-around is
    #      killed by the precomputed 0/1 mask (exact: taps are finite). ----
    for t in range(9):
        dy, dx = t // 3 - 1, t % 3 - 1
        if dy == 0 and dx == 0:
            cols_ref[t * cin_p:(t + 1) * cin_p, :] = x
        else:
            off = dy * W + dx
            tap = xpad_ref[:, _PAD0 + off:_PAD0 + off + NP]     # x[c, p + off]
            cols_ref[t * cin_p:(t + 1) * cin_p, :] = (
                tap * mask_ref[t * cin_p:(t + 1) * cin_p, :])

    # ---- single MXU matmul over K = 9*Cin_p, then ReLU ----
    y = jnp.maximum(
        jnp.dot(wk, cols_ref[...], preferred_element_type=jnp.float32), 0.0)

    # ---- 2x2 max-pool: max of 4 shifted windows, then exact lane compaction
    #      via a one-hot selection matmul (MXU, numerically exact). ----
    ypad_ref[...] = jnp.zeros(ypad_ref.shape, ypad_ref.dtype)
    ypad_ref[:, 0:NP] = y
    m = jnp.maximum(
        jnp.maximum(y, ypad_ref[:, 1:NP + 1]),
        jnp.maximum(ypad_ref[:, W:NP + W], ypad_ref[:, W + 1:NP + W + 1]))
    return jnp.dot(m, sel_ref[...], preferred_element_type=jnp.float32)


def _encoder_kernel(x_ref, w1_ref, w2_ref, w3_ref,
                    m1_ref, m2_ref, m3_ref,
                    s1_ref, s2_ref, s3_ref,
                    o_ref,
                    xp1, cl1, yp1, xp2, cl2, yp2, xp3, cl3, yp3,
                    *, nb, h, w):
    x = x_ref[0]                                               # (8, nb*h*w)
    p1 = _conv_relu_pool(x, w1_ref[...], m1_ref, s1_ref,
                         nb, h, w, xp1, cl1, yp1)
    p2 = _conv_relu_pool(p1, w2_ref[...], m2_ref, s2_ref,
                         nb, h // 2, w // 2, xp2, cl2, yp2)
    p3 = _conv_relu_pool(p2, w3_ref[...], m3_ref, s3_ref,
                         nb, h // 4, w // 4, xp3, cl3, yp3)
    o_ref[0] = p3.astype(o_ref.dtype)


def _tap_mask(nb, H, W, cin_p):
    """(9*cin_p, nb*H*W) 0/1 mask: rows [t*cin_p:(t+1)*cin_p] = validity of tap t."""
    p = np.arange(H * W)
    ii, jj = p // W, p % W
    rows = []
    for t in range(9):
        dy, dx = t // 3 - 1, t % 3 - 1
        valid = ((ii + dy >= 0) & (ii + dy < H) &
                 (jj + dx >= 0) & (jj + dx < W)).astype(np.float32)
        valid = np.tile(valid, nb)                              # (nb*H*W,)
        rows.append(np.broadcast_to(valid, (cin_p, nb * H * W)))
    return np.ascontiguousarray(np.concatenate(rows, axis=0))


def _pool_select(nb, H, W):
    """One-hot S[p, q] = 1 iff p == n*H*W + 2*qi*W + 2*qj (exact pool gather)."""
    Hh, Wh = H // 2, W // 2
    NP, NQ = nb * H * W, nb * Hh * Wh
    q = np.arange(NQ)
    n_idx = q // (Hh * Wh)
    rem = q % (Hh * Wh)
    qi, qj = rem // Wh, rem % Wh
    src = n_idx * (H * W) + 2 * qi * W + 2 * qj
    sel = np.zeros((NP, NQ), np.float32)
    sel[src, q] = 1.0
    return sel


def encoder_forward(x_nchw, params):
    """Matches Encoder.forward: conv1 -> conv2 -> conv3 (each conv+relu+pool)."""
    w1, w2, w3 = params
    n, cin, h, w = x_nchw.shape
    assert h % 8 == 0 and w % 8 == 0 and w + 1 <= _PAD0
    c1p = 8                                            # pad Cin 3 -> 8 (aligned K)
    c1o, c2o, c3o = w1.shape[0], w2.shape[0], w3.shape[0]

    ns = 2 if n % 2 == 0 else 1                        # 2-way parallel grid (v7x)
    nb = n // ns
    h2, w2s, h3, w3s = h // 2, w // 2, h // 4, w // 4
    ho, wo = h // 8, w // 8
    np1, np2, np3 = nb * h * w, nb * h2 * w2s, nb * h3 * w3s

    # ---- layout-only glue (tiny XLA ops) ----
    xs = x_nchw.reshape(ns, nb, cin, h, w).transpose(0, 2, 1, 3, 4)
    xs = xs.reshape(ns, cin, nb * h * w)
    xs = jnp.pad(xs, ((0, 0), (0, c1p - cin), (0, 0)))           # (ns, 8, nb*h*w)

    def flat_w(wt, cpad):
        o, ci = wt.shape[0], wt.shape[1]
        wt = jnp.transpose(wt, (0, 2, 3, 1))                     # (O, ky, kx, Ci)
        wt = jnp.pad(wt, ((0, 0), (0, 0), (0, 0), (0, cpad - ci)))
        return wt.reshape(o, 9 * cpad)                           # K = (tap, channel)

    w1f, w2f, w3f = flat_w(w1, c1p), flat_w(w2, c1o), flat_w(w3, c2o)

    # ---- host-built compile-time constants (masks + pool selection) ----
    m1 = jnp.asarray(_tap_mask(nb, h, w, c1p))
    m2 = jnp.asarray(_tap_mask(nb, h2, w2s, c1o))
    m3 = jnp.asarray(_tap_mask(nb, h3, w3s, c2o))
    s1 = jnp.asarray(_pool_select(nb, h, w))
    s2 = jnp.asarray(_pool_select(nb, h2, w2s))
    s3 = jnp.asarray(_pool_select(nb, h3, w3s))

    kern = functools.partial(_encoder_kernel, nb=nb, h=h, w=w)
    f32 = jnp.float32
    scratch = [
        pltpu.VMEM((c1p, np1 + 2 * _PAD0), f32),   # xp1 (zero-padded activation)
        pltpu.VMEM((9 * c1p, np1), f32),           # cols1 (im2col)
        pltpu.VMEM((c1o, np1 + _PAD0), f32),       # ypad1 (pool staging)
        pltpu.VMEM((c1o, np2 + 2 * _PAD0), f32),   # xp2
        pltpu.VMEM((9 * c1o, np2), f32),           # cols2
        pltpu.VMEM((c2o, np2 + _PAD0), f32),       # ypad2
        pltpu.VMEM((c2o, np3 + 2 * _PAD0), f32),   # xp3
        pltpu.VMEM((9 * c2o, np3), f32),           # cols3
        pltpu.VMEM((c3o, np3 + _PAD0), f32),       # ypad3
    ]

    const2 = lambda s: (0, 0)
    out = pl.pallas_call(
        kern,
        out_shape=jax.ShapeDtypeStruct((ns, c3o, nb * ho * wo), x_nchw.dtype),
        grid_spec=pltpu.PrefetchScalarGridSpec(
            num_scalar_prefetch=0,
            grid=(ns,),
            in_specs=[
                pl.BlockSpec((1, c1p, np1), lambda s: (s, 0, 0)),   # x
                pl.BlockSpec((c1o, 9 * c1p), const2),               # w1
                pl.BlockSpec((c2o, 9 * c1o), const2),               # w2
                pl.BlockSpec((c3o, 9 * c2o), const2),               # w3
                pl.BlockSpec((9 * c1p, np1), const2),               # mask1
                pl.BlockSpec((9 * c1o, np2), const2),               # mask2
                pl.BlockSpec((9 * c2o, np3), const2),               # mask3
                pl.BlockSpec((np1, np1 // 4), const2),              # sel1
                pl.BlockSpec((np2, np2 // 4), const2),              # sel2
                pl.BlockSpec((np3, np3 // 4), const2),              # sel3
            ],
            out_specs=pl.BlockSpec((1, c3o, nb * ho * wo), lambda s: (s, 0, 0)),
            scratch_shapes=scratch,
        ),
        compiler_params=pltpu.CompilerParams(
            dimension_semantics=("parallel",)),
    )(xs, w1f, w2f, w3f, m1, m2, m3, s1, s2, s3)

    out = out.reshape(ns, c3o, nb, ho, wo).transpose(0, 2, 1, 3, 4)
    return out.reshape(n, c3o, ho, wo)                # back to NCHW


def reference_forward(x_nchw, params):
    """Pure-JAX reference (lax.conv + reduce_window) for correctness check."""
    y = jnp.transpose(x_nchw, (0, 2, 3, 1))
    for wt in params:
        wf = jnp.transpose(wt, (2, 3, 1, 0))          # OIHW -> HWIO
        y = jax.lax.conv_general_dilated(
            y, wf, window_strides=(1, 1), padding="SAME",
            dimension_numbers=("NHWC", "HWIO", "NHWC"))
        y = jnp.maximum(y, 0.0)
        y = jax.lax.reduce_window(y, -jnp.inf, jax.lax.max,
                                  (1, 2, 2, 1), (1, 2, 2, 1), "VALID")
    return jnp.transpose(y, (0, 3, 1, 2))


def init_params(key):
    # Conv weights (bias=False): (Cout, Cin, 3, 3), deterministic He-style init.
    shapes = [(8, 3, 3, 3), (16, 8, 3, 3), (16, 16, 3, 3)]
    params = []
    for i, s in enumerate(shapes):
        k = jax.random.fold_in(key, i)
        fan_in = s[1] * s[2] * s[3]
        params.append(jax.random.normal(k, s, jnp.float32) * (2.0 / fan_in) ** 0.5)
    return params


if __name__ == "__main__":
    key = jax.random.PRNGKey(0)
    params = init_params(jax.random.fold_in(key, 1))
    # Small NCHW input consistent with the module (3 input channels).
    x = jax.random.normal(jax.random.fold_in(key, 2), (2, 3, 16, 16), jnp.float32)

    fwd = jax.jit(encoder_forward)
    out = jax.block_until_ready(fwd(x, params))        # (2, 16, 2, 2)
    ref = reference_forward(x, params)
    np.testing.assert_allclose(np.asarray(out), np.asarray(ref),
                               rtol=1e-4, atol=1e-4)
    print("KERNEL_OK")
</pallas_src>

<mosaic_0001>
module attributes {stable_mosaic.version = 11 : i64} {
  func.func @_encoder_kernel(%arg0: i32, %arg1: memref<1x8x256xf32, #tpu.memory_space<vmem>>, %arg2: memref<8x72xf32, #tpu.memory_space<vmem>>, %arg3: memref<16x72xf32, #tpu.memory_space<vmem>>, %arg4: memref<16x144xf32, #tpu.memory_space<vmem>>, %arg5: memref<72x256xf32, #tpu.memory_space<vmem>>, %arg6: memref<72x64xf32, #tpu.memory_space<vmem>>, %arg7: memref<144x16xf32, #tpu.memory_space<vmem>>, %arg8: memref<256x64xf32, #tpu.memory_space<vmem>>, %arg9: memref<64x16xf32, #tpu.memory_space<vmem>>, %arg10: memref<16x4xf32, #tpu.memory_space<vmem>>, %arg11: memref<1x16x4xf32, #tpu.memory_space<vmem>>, %arg12: memref<8x512xf32, #tpu.memory_space<vmem>>, %arg13: memref<72x256xf32, #tpu.memory_space<vmem>>, %arg14: memref<8x384xf32, #tpu.memory_space<vmem>>, %arg15: memref<8x320xf32, #tpu.memory_space<vmem>>, %arg16: memref<72x64xf32, #tpu.memory_space<vmem>>, %arg17: memref<16x192xf32, #tpu.memory_space<vmem>>, %arg18: memref<16x272xf32, #tpu.memory_space<vmem>>, %arg19: memref<144x16xf32, #tpu.memory_space<vmem>>, %arg20: memref<16x144xf32, #tpu.memory_space<vmem>>) attributes {dimension_semantics = [#tpu.dimension_semantics<parallel>], iteration_bounds = array<i64: 2>, scalar_prefetch = 0 : i64, scratch_operands = 9 : i64, tpu.core_type = #tpu.core_type<tc>, window_params = [{transform_indices = @transform_0, window_bounds = array<i64: 1, 8, 256>}, {pipeline_mode = #tpu.pipeline_mode<synchronous>, transform_indices = @transform_1, window_bounds = array<i64: 8, 72>}, {pipeline_mode = #tpu.pipeline_mode<synchronous>, transform_indices = @transform_2, window_bounds = array<i64: 16, 72>}, {pipeline_mode = #tpu.pipeline_mode<synchronous>, transform_indices = @transform_3, window_bounds = array<i64: 16, 144>}, {pipeline_mode = #tpu.pipeline_mode<synchronous>, transform_indices = @transform_4, window_bounds = array<i64: 72, 256>}, {pipeline_mode = #tpu.pipeline_mode<synchronous>, transform_indices = @transform_5, window_bounds = array<i64: 72, 64>}, {pipeline_mode = #tpu.pipeline_mode<synchronous>, transform_indices = @transform_6, window_bounds = array<i64: 144, 16>}, {pipeline_mode = #tpu.pipeline_mode<synchronous>, transform_indices = @transform_7, window_bounds = array<i64: 256, 64>}, {pipeline_mode = #tpu.pipeline_mode<synchronous>, transform_indices = @transform_8, window_bounds = array<i64: 64, 16>}, {pipeline_mode = #tpu.pipeline_mode<synchronous>, transform_indices = @transform_9, window_bounds = array<i64: 16, 4>}, {transform_indices = @transform_10, window_bounds = array<i64: 1, 16, 4>}]} {
    %c0 = arith.constant 0 : index
    %c0_0 = arith.constant 0 : index
    %c0_1 = arith.constant 0 : index
    %0 = vector.load %arg1[%c0, %c0_0, %c0_1] : memref<1x8x256xf32, #tpu.memory_space<vmem>>, vector<1x8x256xf32>
    %1 = vector.shape_cast %0 : vector<1x8x256xf32> to vector<8x256xf32>
    %c0_2 = arith.constant 0 : index
    %c0_3 = arith.constant 0 : index
    %2 = vector.load %arg2[%c0_2, %c0_3] : memref<8x72xf32, #tpu.memory_space<vmem>>, vector<8x72xf32>
    %cst = arith.constant 0.000000e+00 : f32
    %3 = vector.broadcast %cst : f32 to vector<8x512xf32>
    %c0_4 = arith.constant 0 : index
    %c0_5 = arith.constant 0 : index
    %4 = vector.load %arg12[%c0_4, %c0_5] : memref<8x512xf32, #tpu.memory_space<vmem>>, vector<8x512xf32>
    tpu.vector_store %arg12[%c0_4, %c0_5], %3 {strides = array<i32>} : memref<8x512xf32, #tpu.memory_space<vmem>>, vector<8x512xf32>,
    %c0_6 = arith.constant 0 : index
    %c128 = arith.constant 128 : index
    %5 = vector.load %arg12[%c0_6, %c128] : memref<8x512xf32, #tpu.memory_space<vmem>>, vector<8x256xf32>
    tpu.vector_store %arg12[%c0_6, %c128], %1 {strides = array<i32>} : memref<8x512xf32, #tpu.memory_space<vmem>>, vector<8x256xf32>,
    %c0_7 = arith.constant 0 : index
    %c111 = arith.constant 111 : index
    %6 = vector.load %arg12[%c0_7, %c111] : memref<8x512xf32, #tpu.memory_space<vmem>>, vector<8x256xf32>
    %c0_8 = arith.constant 0 : index
    %c0_9 = arith.constant 0 : index
    %7 = vector.load %arg5[%c0_8, %c0_9] : memref<72x256xf32, #tpu.memory_space<vmem>>, vector<8x256xf32>
    %8 = arith.mulf %6, %7 : vector<8x256xf32>
    %c0_10 = arith.constant 0 : index
    %c0_11 = arith.constant 0 : index
    %9 = vector.load %arg13[%c0_10, %c0_11] : memref<72x256xf32, #tpu.memory_space<vmem>>, vector<8x256xf32>
    tpu.vector_store %arg13[%c0_10, %c0_11], %8 {strides = array<i32>} : memref<72x256xf32, #tpu.memory_space<vmem>>, vector<8x256xf32>,
    %c0_12 = arith.constant 0 : index
    %c112 = arith.constant 112 : index
    %10 = vector.load %arg12[%c0_12, %c112] : memref<8x512xf32, #tpu.memory_space<vmem>>, vector<8x256xf32>
    %c8 = arith.constant 8 : index
    %c0_13 = arith.constant 0 : index
    %11 = vector.load %arg5[%c8, %c0_13] : memref<72x256xf32, #tpu.memory_space<vmem>>, vector<8x256xf32>
    %12 = arith.mulf %10, %11 : vector<8x256xf32>
    %c8_14 = arith.constant 8 : index
    %c0_15 = arith.constant 0 : index
    %13 = vector.load %arg13[%c8_14, %c0_15] : memref<72x256xf32, #tpu.memory_space<vmem>>, vector<8x256xf32>
    tpu.vector_store %arg13[%c8_14, %c0_15], %12 {strides = array<i32>} : memref<72x256xf32, #tpu.memory_space<vmem>>, vector<8x256xf32>,
    %c0_16 = arith.constant 0 : index
    %c113 = arith.constant 113 : index
    %14 = vector.load %arg12[%c0_16, %c113] : memref<8x512xf32, #tpu.memory_space<vmem>>, vector<8x256xf32>
    %c16 = arith.constant 16 : index
    %c0_17 = arith.constant 0 : index
    %15 = vector.load %arg5[%c16, %c0_17] : memref<72x256xf32, #tpu.memory_space<vmem>>, vector<8x256xf32>
    %16 = arith.mulf %14, %15 : vector<8x256xf32>
    %c16_18 = arith.constant 16 : index
    %c0_19 = arith.constant 0 : index
    %17 = vector.load %arg13[%c16_18, %c0_19] : memref<72x256xf32, #tpu.memory_space<vmem>>, vector<8x256xf32>
    tpu.vector_store %arg13[%c16_18, %c0_19], %16 {strides = array<i32>} : memref<72x256xf32, #tpu.memory_space<vmem>>, vector<8x256xf32>,
    %c0_20 = arith.constant 0 : index
    %c127 = arith.constant 127 : index
    %18 = vector.load %arg12[%c0_20, %c127] : memref<8x512xf32, #tpu.memory_space<vmem>>, vector<8x256xf32>
    %c24 = arith.constant 24 : index
    %c0_21 = arith.constant 0 : index
    %19 = vector.load %arg5[%c24, %c0_21] : memref<72x256xf32, #tpu.memory_space<vmem>>, vector<8x256xf32>
    %20 = arith.mulf %18, %19 : vector<8x256xf32>
    %c24_22 = arith.constant 24 : index
    %c0_23 = arith.constant 0 : index
    %21 = vector.load %arg13[%c24_22, %c0_23] : memref<72x256xf32, #tpu.memory_space<vmem>>, vector<8x256xf32>
    tpu.vector_store %arg13[%c24_22, %c0_23], %20 {strides = array<i32>} : memref<72x256xf32, #tpu.memory_space<vmem>>, vector<8x256xf32>,
    %c32 = arith.constant 32 : index
    %c0_24 = arith.constant 0 : index
    %22 = vector.load %arg13[%c32, %c0_24] : memref<72x256xf32, #tpu.memory_space<vmem>>, vector<8x256xf32>
    tpu.vector_store %arg13[%c32, %c0_24], %1 {strides = array<i32>} : memref<72x256xf32, #tpu.memory_space<vmem>>, vector<8x256xf32>,
    %c0_25 = arith.constant 0 : index
    %c129 = arith.constant 129 : index
    %23 = vector.load %arg12[%c0_25, %c129] : memref<8x512xf32, #tpu.memory_space<vmem>>, vector<8x256xf32>
    %c40 = arith.constant 40 : index
    %c0_26 = arith.constant 0 : index
    %24 = vector.load %arg5[%c40, %c0_26] : memref<72x256xf32, #tpu.memory_space<vmem>>, vector<8x256xf32>
    %25 = arith.mulf %23, %24 : vector<8x256xf32>
    %c40_27 = arith.constant 40 : index
    %c0_28 = arith.constant 0 : index
    %26 = vector.load %arg13[%c40_27, %c0_28] : memref<72x256xf32, #tpu.memory_space<vmem>>, vector<8x256xf32>
    tpu.vector_store %arg13[%c40_27, %c0_28], %25 {strides = array<i32>} : memref<72x256xf32, #tpu.memory_space<vmem>>, vector<8x256xf32>,
    %c0_29 = arith.constant 0 : index
    %c143 = arith.constant 143 : index
    %27 = vector.load %arg12[%c0_29, %c143] : memref<8x512xf32, #tpu.memory_space<vmem>>, vector<8x256xf32>
    %c48 = arith.constant 48 : index
    %c0_30 = arith.constant 0 : index
    %28 = vector.load %arg5[%c48, %c0_30] : memref<72x256xf32, #tpu.memory_space<vmem>>, vector<8x256xf32>
    %29 = arith.mulf %27, %28 : vector<8x256xf32>
    %c48_31 = arith.constant 48 : index
    %c0_32 = arith.constant 0 : index
    %30 = vector.load %arg13[%c48_31, %c0_32] : memref<72x256xf32, #tpu.memory_space<vmem>>, vector<8x256xf32>
    tpu.vector_store %arg13[%c48_31, %c0_32], %29 {strides = array<i32>} : memref<72x256xf32, #tpu.memory_space<vmem>>, vector<8x256xf32>,
    %c0_33 = arith.constant 0 : index
    %c144 = arith.constant 144 : index
    %31 = vector.load %arg12[%c0_33, %c144] : memref<8x512xf32, #tpu.memory_space<vmem>>, vector<8x256xf32>
    %c56 = arith.constant 56 : index
    %c0_34 = arith.constant 0 : index
    %32 = vector.load %arg5[%c56, %c0_34] : memref<72x256xf32, #tpu.memory_space<vmem>>, vector<8x256xf32>
    %33 = arith.mulf %31, %32 : vector<8x256xf32>
    %c56_35 = arith.constant 56 : index
    %c0_36 = arith.constant 0 : index
    %34 = vector.load %arg13[%c56_35, %c0_36] : memref<72x256xf32, #tpu.memory_space<vmem>>, vector<8x256xf32>
    tpu.vector_store %arg13[%c56_35, %c0_36], %33 {strides = array<i32>} : memref<72x256xf32, #tpu.memory_space<vmem>>, vector<8x256xf32>,
    %c0_37 = arith.constant 0 : index
    %c145 = arith.constant 145 : index
    %35 = vector.load %arg12[%c0_37, %c145] : memref<8x512xf32, #tpu.memory_space<vmem>>, vector<8x256xf32>
    %c64 = arith.constant 64 : index
    %c0_38 = arith.constant 0 : index
    %36 = vector.load %arg5[%c64, %c0_38] : memref<72x256xf32, #tpu.memory_space<vmem>>, vector<8x256xf32>
    %37 = arith.mulf %35, %36 : vector<8x256xf32>
    %c64_39 = arith.constant 64 : index
    %c0_40 = arith.constant 0 : index
    %38 = vector.load %arg13[%c64_39, %c0_40] : memref<72x256xf32, #tpu.memory_space<vmem>>, vector<8x256xf32>
    tpu.vector_store %arg13[%c64_39, %c0_40], %37 {strides = array<i32>} : memref<72x256xf32, #tpu.memory_space<vmem>>, vector<8x256xf32>,
    %c0_41 = arith.constant 0 : index
    %c0_42 = arith.constant 0 : index
    %39 = vector.load %arg13[%c0_41, %c0_42] : memref<72x256xf32, #tpu.memory_space<vmem>>, vector<72x256xf32>
    %cst_43 = arith.constant dense<0.000000e+00> : vector<8x256xf32>
    %40 = tpu.matmul %2, %39, %cst_43 {dimension_numbers = #tpu.dot_dimension_numbers<[1], [0], [0], [1], [0, 0, 1, 1], [], []>} : vector<8x72xf32>, vector<72x256xf32>, vector<8x256xf32> -> vector<8x256xf32>
    %cst_44 = arith.constant 0.000000e+00 : f32
    %41 = vector.broadcast %cst_44 : f32 to vector<8x256xf32>
    %42 = arith.maximumf %40, %41 : vector<8x256xf32>
    %cst_45 = arith.constant 0.000000e+00 : f32
    %43 = vector.broadcast %cst_45 : f32 to vector<8x384xf32>
    %c0_46 = arith.constant 0 : index
    %c0_47 = arith.constant 0 : index
    %44 = vector.load %arg14[%c0_46, %c0_47] : memref<8x384xf32, #tpu.memory_space<vmem>>, vector<8x384xf32>
    tpu.vector_store %arg14[%c0_46, %c0_47], %43 {strides = array<i32>} : memref<8x384xf32, #tpu.memory_space<vmem>>, vector<8x384xf32>,
    %c0_48 = arith.constant 0 : index
    %c0_49 = arith.constant 0 : index
    %45 = vector.load %arg14[%c0_48, %c0_49] : memref<8x384xf32, #tpu.memory_space<vmem>>, vector<8x256xf32>
    tpu.vector_store %arg14[%c0_48, %c0_49], %42 {strides = array<i32>} : memref<8x384xf32, #tpu.memory_space<vmem>>, vector<8x256xf32>,
    %c0_50 = arith.constant 0 : index
    %c1 = arith.constant 1 : index
    %46 = vector.load %arg14[%c0_50, %c1] : memref<8x384xf32, #tpu.memory_space<vmem>>, vector<8x256xf32>
    %47 = arith.maximumf %42, %46 : vector<8x256xf32>
    %c0_51 = arith.constant 0 : index
    %c16_52 = arith.constant 16 : index
    %48 = vector.load %arg14[%c0_51, %c16_52] : memref<8x384xf32, #tpu.memory_space<vmem>>, vector<8x256xf32>
    %c0_53 = arith.constant 0 : index
    %c17 = arith.constant 17 : index
    %49 = vector.load %arg14[%c0_53, %c17] : memref<8x384xf32, #tpu.memory_space<vmem>>, vector<8x256xf32>
    %50 = arith.maximumf %48, %49 : vector<8x256xf32>
    %51 = arith.maximumf %47, %50 : vector<8x256xf32>
    %c0_54 = arith.constant 0 : index
    %c0_55 = arith.constant 0 : index
    %52 = vector.load %arg8[%c0_54, %c0_55] : memref<256x64xf32, #tpu.memory_space<vmem>>, vector<256x64xf32>
    %cst_56 = arith.constant dense<0.000000e+00> : vector<8x64xf32>
    %53 = tpu.matmul %51, %52, %cst_56 {dimension_numbers = #tpu.dot_dimension_numbers<[1], [0], [0], [1], [0, 0, 1, 1], [], []>} : vector<8x256xf32>, vector<256x64xf32>, vector<8x64xf32> -> vector<8x64xf32>
    %c0_57 = arith.constant 0 : index
    %c0_58 = arith.constant 0 : index
    %54 = vector.load %arg3[%c0_57, %c0_58] : memref<16x72xf32, #tpu.memory_space<vmem>>, vector<16x72xf32>
    %cst_59 = arith.constant 0.000000e+00 : f32
    %55 = vector.broadcast %cst_59 : f32 to vector<8x320xf32>
    %c0_60 = arith.constant 0 : index
    %c0_61 = arith.constant 0 : index
    %56 = vector.load %arg15[%c0_60, %c0_61] : memref<8x320xf32, #tpu.memory_space<vmem>>, vector<8x320xf32>
    tpu.vector_store %arg15[%c0_60, %c0_61], %55 {strides = array<i32>} : memref<8x320xf32, #tpu.memory_space<vmem>>, vector<8x320xf32>,
    %c0_62 = arith.constant 0 : index
    %c128_63 = arith.constant 128 : index
    %57 = vector.load %arg15[%c0_62, %c128_63] : memref<8x320xf32, #tpu.memory_space<vmem>>, vector<8x64xf32>
    tpu.vector_store %arg15[%c0_62, %c128_63], %53 {strides = array<i32>} : memref<8x320xf32, #tpu.memory_space<vmem>>, vector<8x64xf32>,
    %c0_64 = arith.constant 0 : index
    %c119 = arith.constant 119 : index
    %58 = vector.load %arg15[%c0_64, %c119] : memref<8x320xf32, #tpu.memory_space<vmem>>, vector<8x64xf32>
    %c0_65 = arith.constant 0 : index
    %c0_66 = arith.constant 0 : index
    %59 = vector.load %arg6[%c0_65, %c0_66] : memref<72x64xf32, #tpu.memory_space<vmem>>, vector<8x64xf32>
    %60 = arith.mulf %58, %59 : vector<8x64xf32>
    %c0_67 = arith.constant 0 : index
    %c0_68 = arith.constant 0 : index
    %61 = vector.load %arg16[%c0_67, %c0_68] : memref<72x64xf32, #tpu.memory_space<vmem>>, vector<8x64xf32>
    tpu.vector_store %arg16[%c0_67, %c0_68], %60 {strides = array<i32>} : memref<72x64xf32, #tpu.memory_space<vmem>>, vector<8x64xf32>,
    %c0_69 = arith.constant 0 : index
    %c120 = arith.constant 120 : index
    %62 = vector.load %arg15[%c0_69, %c120] : memref<8x320xf32, #tpu.memory_space<vmem>>, vector<8x64xf32>
    %c8_70 = arith.constant 8 : index
    %c0_71 = arith.constant 0 : index
    %63 = vector.load %arg6[%c8_70, %c0_71] : memref<72x64xf32, #tpu.memory_space<vmem>>, vector<8x64xf32>
    %64 = arith.mulf %62, %63 : vector<8x64xf32>
    %c8_72 = arith.constant 8 : index
    %c0_73 = arith.constant 0 : index
    %65 = vector.load %arg16[%c8_72, %c0_73] : memref<72x64xf32, #tpu.memory_space<vmem>>, vector<8x64xf32>
    tpu.vector_store %arg16[%c8_72, %c0_73], %64 {strides = array<i32>} : memref<72x64xf32, #tpu.memory_space<vmem>>, vector<8x64xf32>,
    %c0_74 = arith.constant 0 : index
    %c121 = arith.constant 121 : index
    %66 = vector.load %arg15[%c0_74, %c121] : memref<8x320xf32, #tpu.memory_space<vmem>>, vector<8x64xf32>
    %c16_75 = arith.constant 16 : index
    %c0_76 = arith.constant 0 : index
    %67 = vector.load %arg6[%c16_75, %c0_76] : memref<72x64xf32, #tpu.memory_space<vmem>>, vector<8x64xf32>
    %68 = arith.mulf %66, %67 : vector<8x64xf32>
    %c16_77 = arith.constant 16 : index
    %c0_78 = arith.constant 0 : index
    %69 = vector.load %arg16[%c16_77, %c0_78] : memref<72x64xf32, #tpu.memory_space<vmem>>, vector<8x64xf32>
    tpu.vector_store %arg16[%c16_77, %c0_78], %68 {strides = array<i32>} : memref<72x64xf32, #tpu.memory_space<vmem>>, vector<8x64xf32>,
    %c0_79 = arith.constant 0 : index
    %c127_80 = arith.constant 127 : index
    %70 = vector.load %arg15[%c0_79, %c127_80] : memref<8x320xf32, #tpu.memory_space<vmem>>, vector<8x64xf32>
    %c24_81 = arith.constant 24 : index
    %c0_82 = arith.constant 0 : index
    %71 = vector.load %arg6[%c24_81, %c0_82] : memref<72x64xf32, #tpu.memory_space<vmem>>, vector<8x64xf32>
    %72 = arith.mulf %70, %71 : vector<8x64xf32>
    %c24_83 = arith.constant 24 : index
    %c0_84 = arith.constant 0 : index
    %73 = vector.load %arg16[%c24_83, %c0_84] : memref<72x64xf32, #tpu.memory_space<vmem>>, vector<8x64xf32>
    tpu.vector_store %arg16[%c24_83, %c0_84], %72 {strides = array<i32>} : memref<72x64xf32, #tpu.memory_space<vmem>>, vector<8x64xf32>,
    %c32_85 = arith.constant 32 : index
    %c0_86 = arith.constant 0 : index
    %74 = vector.load %arg16[%c32_85, %c0_86] : memref<72x64xf32, #tpu.memory_space<vmem>>, vector<8x64xf32>
    tpu.vector_store %arg16[%c32_85, %c0_86], %53 {strides = array<i32>} : memref<72x64xf32, #tpu.memory_space<vmem>>, vector<8x64xf32>,
    %c0_87 = arith.constant 0 : index
    %c129_88 = arith.constant 129 : index
    %75 = vector.load %arg15[%c0_87, %c129_88] : memref<8x320xf32, #tpu.memory_space<vmem>>, vector<8x64xf32>
    %c40_89 = arith.constant 40 : index
    %c0_90 = arith.constant 0 : index
    %76 = vector.load %arg6[%c40_89, %c0_90] : memref<72x64xf32, #tpu.memory_space<vmem>>, vector<8x64xf32>
    %77 = arith.mulf %75, %76 : vector<8x64xf32>
    %c40_91 = arith.constant 40 : index
    %c0_92 = arith.constant 0 : index
    %78 = vector.load %arg16[%c40_91, %c0_92] : memref<72x64xf32, #tpu.memory_space<vmem>>, vector<8x64xf32>
    tpu.vector_store %arg16[%c40_91, %c0_92], %77 {strides = array<i32>} : memref<72x64xf32, #tpu.memory_space<vmem>>, vector<8x64xf32>,
    %c0_93 = arith.constant 0 : index
    %c135 = arith.constant 135 : index
    %79 = vector.load %arg15[%c0_93, %c135] : memref<8x320xf32, #tpu.memory_space<vmem>>, vector<8x64xf32>
    %c48_94 = arith.constant 48 : index
    %c0_95 = arith.constant 0 : index
    %80 = vector.load %arg6[%c48_94, %c0_95] : memref<72x64xf32, #tpu.memory_space<vmem>>, vector<8x64xf32>
    %81 = arith.mulf %79, %80 : vector<8x64xf32>
    %c48_96 = arith.constant 48 : index
    %c0_97 = arith.constant 0 : index
    %82 = vector.load %arg16[%c48_96, %c0_97] : memref<72x64xf32, #tpu.memory_space<vmem>>, vector<8x64xf32>
    tpu.vector_store %arg16[%c48_96, %c0_97], %81 {strides = array<i32>} : memref<72x64xf32, #tpu.memory_space<vmem>>, vector<8x64xf32>,
    %c0_98 = arith.constant 0 : index
    %c136 = arith.constant 136 : index
    %83 = vector.load %arg15[%c0_98, %c136] : memref<8x320xf32, #tpu.memory_space<vmem>>, vector<8x64xf32>
    %c56_99 = arith.constant 56 : index
    %c0_100 = arith.constant 0 : index
    %84 = vector.load %arg6[%c56_99, %c0_100] : memref<72x64xf32, #tpu.memory_space<vmem>>, vector<8x64xf32>
    %85 = arith.mulf %83, %84 : vector<8x64xf32>
    %c56_101 = arith.constant 56 : index
    %c0_102 = arith.constant 0 : index
    %86 = vector.load %arg16[%c56_101, %c0_102] : memref<72x64xf32, #tpu.memory_space<vmem>>, vector<8x64xf32>
    tpu.vector_store %arg16[%c56_101, %c0_102], %85 {strides = array<i32>} : memref<72x64xf32, #tpu.memory_space<vmem>>, vector<8x64xf32>,
    %c0_103 = arith.constant 0 : index
    %c137 = arith.constant 137 : index
    %87 = vector.load %arg15[%c0_103, %c137] : memref<8x320xf32, #tpu.memory_space<vmem>>, vector<8x64xf32>
    %c64_104 = arith.constant 64 : index
    %c0_105 = arith.constant 0 : index
    %88 = vector.load %arg6[%c64_104, %c0_105] : memref<72x64xf32, #tpu.memory_space<vmem>>, vector<8x64xf32>
    %89 = arith.mulf %87, %88 : vector<8x64xf32>
    %c64_106 = arith.constant 64 : index
    %c0_107 = arith.constant 0 : index
    %90 = vector.load %arg16[%c64_106, %c0_107] : memref<72x64xf32, #tpu.memory_space<vmem>>, vector<8x64xf32>
    tpu.vector_store %arg16[%c64_106, %c0_107], %89 {strides = array<i32>} : memref<72x64xf32, #tpu.memory_space<vmem>>, vector<8x64xf32>,
    %c0_108 = arith.constant 0 : index
    %c0_109 = arith.constant 0 : index
    %91 = vector.load %arg16[%c0_108, %c0_109] : memref<72x64xf32, #tpu.memory_space<vmem>>, vector<72x64xf32>
    %cst_110 = arith.constant dense<0.000000e+00> : vector<16x64xf32>
    %92 = tpu.matmul %54, %91, %cst_110 {dimension_numbers = #tpu.dot_dimension_numbers<[1], [0], [0], [1], [0, 0, 1, 1], [], []>} : vector<16x72xf32>, vector<72x64xf32>, vector<16x64xf32> -> vector<16x64xf32>
    %cst_111 = arith.constant 0.000000e+00 : f32
    %93 = vector.broadcast %cst_111 : f32 to vector<16x64xf32>
    %94 = arith.maximumf %92, %93 : vector<16x64xf32>
    %cst_112 = arith.constant 0.000000e+00 : f32
    %95 = vector.broadcast %cst_112 : f32 to vector<16x192xf32>
    %c0_113 = arith.constant 0 : index
    %c0_114 = arith.constant 0 : index
    %96 = vector.load %arg17[%c0_113, %c0_114] : memref<16x192xf32, #tpu.memory_space<vmem>>, vector<16x192xf32>
    tpu.vector_store %arg17[%c0_113, %c0_114], %95 {strides = array<i32>} : memref<16x192xf32, #tpu.memory_space<vmem>>, vector<16x192xf32>,
    %c0_115 = arith.constant 0 : index
    %c0_116 = arith.constant 0 : index
    %97 = vector.load %arg17[%c0_115, %c0_116] : memref<16x192xf32, #tpu.memory_space<vmem>>, vector<16x64xf32>
    tpu.vector_store %arg17[%c0_115, %c0_116], %94 {strides = array<i32>} : memref<16x192xf32, #tpu.memory_space<vmem>>, vector<16x64xf32>,
    %c0_117 = arith.constant 0 : index
    %c1_118 = arith.constant 1 : index
    %98 = vector.load %arg17[%c0_117, %c1_118] : memref<16x192xf32, #tpu.memory_space<vmem>>, vector<16x64xf32>
    %99 = arith.maximumf %94, %98 : vector<16x64xf32>
    %c0_119 = arith.constant 0 : index
    %c8_120 = arith.constant 8 : index
    %100 = vector.load %arg17[%c0_119, %c8_120] : memref<16x192xf32, #tpu.memory_space<vmem>>, vector<16x64xf32>
    %c0_121 = arith.constant 0 : index
    %c9 = arith.constant 9 : index
    %101 = vector.load %arg17[%c0_121, %c9] : memref<16x192xf32, #tpu.memory_space<vmem>>, vector<16x64xf32>
    %102 = arith.maximumf %100, %101 : vector<16x64xf32>
    %103 = arith.maximumf %99, %102 : vector<16x64xf32>
    %c0_122 = arith.constant 0 : index
    %c0_123 = arith.constant 0 : index
    %104 = vector.load %arg9[%c0_122, %c0_123] : memref<64x16xf32, #tpu.memory_space<vmem>>, vector<64x16xf32>
    %cst_124 = arith.constant dense<0.000000e+00> : vector<16x16xf32>
    %105 = tpu.matmul %103, %104, %cst_124 {dimension_numbers = #tpu.dot_dimension_numbers<[1], [0], [0], [1], [0, 0, 1, 1], [], []>} : vector<16x64xf32>, vector<64x16xf32>, vector<16x16xf32> -> vector<16x16xf32>
    %c0_125 = arith.constant 0 : index
    %c0_126 = arith.constant 0 : index
    %106 = vector.load %arg4[%c0_125, %c0_126] : memref<16x144xf32, #tpu.memory_space<vmem>>, vector<16x144xf32>
    %cst_127 = arith.constant 0.000000e+00 : f32
    %107 = vector.broadcast %cst_127 : f32 to vector<16x272xf32>
    %c0_128 = arith.constant 0 : index
    %c0_129 = arith.constant 0 : index
    %108 = vector.load %arg18[%c0_128, %c0_129] : memref<16x272xf32, #tpu.memory_space<vmem>>, vector<16x272xf32>
    tpu.vector_store %arg18[%c0_128, %c0_129], %107 {strides = array<i32>} : memref<16x272xf32, #tpu.memory_space<vmem>>, vector<16x272xf32>,
    %c0_130 = arith.constant 0 : index
    %c128_131 = arith.constant 128 : index
    %109 = vector.load %arg18[%c0_130, %c128_131] : memref<16x272xf32, #tpu.memory_space<vmem>>, vector<16x16xf32>
    tpu.vector_store %arg18[%c0_130, %c128_131], %105 {strides = array<i32>} : memref<16x272xf32, #tpu.memory_space<vmem>>, vector<16x16xf32>,
    %c0_132 = arith.constant 0 : index
    %c123 = arith.constant 123 : index
    %110 = vector.load %arg18[%c0_132, %c123] : memref<16x272xf32, #tpu.memory_space<vmem>>, vector<16x16xf32>
    %c0_133 = arith.constant 0 : index
    %c0_134 = arith.constant 0 : index
    %111 = vector.load %arg7[%c0_133, %c0_134] : memref<144x16xf32, #tpu.memory_space<vmem>>, vector<16x16xf32>
    %112 = arith.mulf %110, %111 : vector<16x16xf32>
    %c0_135 = arith.constant 0 : index
    %c0_136 = arith.constant 0 : index
    %113 = vector.load %arg19[%c0_135, %c0_136] : memref<144x16xf32, #tpu.memory_space<vmem>>, vector<16x16xf32>
    tpu.vector_store %arg19[%c0_135, %c0_136], %112 {strides = array<i32>} : memref<144x16xf32, #tpu.memory_space<vmem>>, vector<16x16xf32>,
    %c0_137 = arith.constant 0 : index
    %c124 = arith.constant 124 : index
    %114 = vector.load %arg18[%c0_137, %c124] : memref<16x272xf32, #tpu.memory_space<vmem>>, vector<16x16xf32>
    %c16_138 = arith.constant 16 : index
    %c0_139 = arith.constant 0 : index
    %115 = vector.load %arg7[%c16_138, %c0_139] : memref<144x16xf32, #tpu.memory_space<vmem>>, vector<16x16xf32>
    %116 = arith.mulf %114, %115 : vector<16x16xf32>
    %c16_140 = arith.constant 16 : index
    %c0_141 = arith.constant 0 : index
    %117 = vector.load %arg19[%c16_140, %c0_141] : memref<144x16xf32, #tpu.memory_space<vmem>>, vector<16x16xf32>
    tpu.vector_store %arg19[%c16_140, %c0_141], %116 {strides = array<i32>} : memref<144x16xf32, #tpu.memory_space<vmem>>, vector<16x16xf32>,
    %c0_142 = arith.constant 0 : index
    %c125 = arith.constant 125 : index
    %118 = vector.load %arg18[%c0_142, %c125] : memref<16x272xf32, #tpu.memory_space<vmem>>, vector<16x16xf32>
    %c32_143 = arith.constant 32 : index
    %c0_144 = arith.constant 0 : index
    %119 = vector.load %arg7[%c32_143, %c0_144] : memref<144x16xf32, #tpu.memory_space<vmem>>, vector<16x16xf32>
    %120 = arith.mulf %118, %119 : vector<16x16xf32>
    %c32_145 = arith.constant 32 : index
    %c0_146 = arith.constant 0 : index
    %121 = vector.load %arg19[%c32_145, %c0_146] : memref<144x16xf32, #tpu.memory_space<vmem>>, vector<16x16xf32>
    tpu.vector_store %arg19[%c32_145, %c0_146], %120 {strides = array<i32>} : memref<144x16xf32, #tpu.memory_space<vmem>>, vector<16x16xf32>,
    %c0_147 = arith.constant 0 : index
    %c127_148 = arith.constant 127 : index
    %122 = vector.load %arg18[%c0_147, %c127_148] : memref<16x272xf32, #tpu.memory_space<vmem>>, vector<16x16xf32>
    %c48_149 = arith.constant 48 : index
    %c0_150 = arith.constant 0 : index
    %123 = vector.load %arg7[%c48_149, %c0_150] : memref<144x16xf32, #tpu.memory_space<vmem>>, vector<16x16xf32>
    %124 = arith.mulf %122, %123 : vector<16x16xf32>
    %c48_151 = arith.constant 48 : index
    %c0_152 = arith.constant 0 : index
    %125 = vector.load %arg19[%c48_151, %c0_152] : memref<144x16xf32, #tpu.memory_space<vmem>>, vector<16x16xf32>
    tpu.vector_store %arg19[%c48_151, %c0_152], %124 {strides = array<i32>} : memref<144x16xf32, #tpu.memory_space<vmem>>, vector<16x16xf32>,
    %c64_153 = arith.constant 64 : index
    %c0_154 = arith.constant 0 : index
    %126 = vector.load %arg19[%c64_153, %c0_154] : memref<144x16xf32, #tpu.memory_space<vmem>>, vector<16x16xf32>
    tpu.vector_store %arg19[%c64_153, %c0_154], %105 {strides = array<i32>} : memref<144x16xf32, #tpu.memory_space<vmem>>, vector<16x16xf32>,
    %c0_155 = arith.constant 0 : index
    %c129_156 = arith.constant 129 : index
    %127 = vector.load %arg18[%c0_155, %c129_156] : memref<16x272xf32, #tpu.memory_space<vmem>>, vector<16x16xf32>
    %c80 = arith.constant 80 : index
    %c0_157 = arith.constant 0 : index
    %128 = vector.load %arg7[%c80, %c0_157] : memref<144x16xf32, #tpu.memory_space<vmem>>, vector<16x16xf32>
    %129 = arith.mulf %127, %128 : vector<16x16xf32>
    %c80_158 = arith.constant 80 : index
    %c0_159 = arith.constant 0 : index
    %130 = vector.load %arg19[%c80_158, %c0_159] : memref<144x16xf32, #tpu.memory_space<vmem>>, vector<16x16xf32>
    tpu.vector_store %arg19[%c80_158, %c0_159], %129 {strides = array<i32>} : memref<144x16xf32, #tpu.memory_space<vmem>>, vector<16x16xf32>,
    %c0_160 = arith.constant 0 : index
    %c131 = arith.constant 131 : index
    %131 = vector.load %arg18[%c0_160, %c131] : memref<16x272xf32, #tpu.memory_space<vmem>>, vector<16x16xf32>
    %c96 = arith.constant 96 : index
    %c0_161 = arith.constant 0 : index
    %132 = vector.load %arg7[%c96, %c0_161] : memref<144x16xf32, #tpu.memory_space<vmem>>, vector<16x16xf32>
    %133 = arith.mulf %131, %132 : vector<16x16xf32>
    %c96_162 = arith.constant 96 : index
    %c0_163 = arith.constant 0 : index
    %134 = vector.load %arg19[%c96_162, %c0_163] : memref<144x16xf32, #tpu.memory_space<vmem>>, vector<16x16xf32>
    tpu.vector_store %arg19[%c96_162, %c0_163], %133 {strides = array<i32>} : memref<144x16xf32, #tpu.memory_space<vmem>>, vector<16x16xf32>,
    %c0_164 = arith.constant 0 : index
    %c132 = arith.constant 132 : index
    %135 = vector.load %arg18[%c0_164, %c132] : memref<16x272xf32, #tpu.memory_space<vmem>>, vector<16x16xf32>
    %c112_165 = arith.constant 112 : index
    %c0_166 = arith.constant 0 : index
    %136 = vector.load %arg7[%c112_165, %c0_166] : memref<144x16xf32, #tpu.memory_space<vmem>>, vector<16x16xf32>
    %137 = arith.mulf %135, %136 : vector<16x16xf32>
    %c112_167 = arith.constant 112 : index
    %c0_168 = arith.constant 0 : index
    %138 = vector.load %arg19[%c112_167, %c0_168] : memref<144x16xf32, #tpu.memory_space<vmem>>, vector<16x16xf32>
    tpu.vector_store %arg19[%c112_167, %c0_168], %137 {strides = array<i32>} : memref<144x16xf32, #tpu.memory_space<vmem>>, vector<16x16xf32>,
    %c0_169 = arith.constant 0 : index
    %c133 = arith.constant 133 : index
    %139 = vector.load %arg18[%c0_169, %c133] : memref<16x272xf32, #tpu.memory_space<vmem>>, vector<16x16xf32>
    %c128_170 = arith.constant 128 : index
    %c0_171 = arith.constant 0 : index
    %140 = vector.load %arg7[%c128_170, %c0_171] : memref<144x16xf32, #tpu.memory_space<vmem>>, vector<16x16xf32>
    %141 = arith.mulf %139, %140 : vector<16x16xf32>
    %c128_172 = arith.constant 128 : index
    %c0_173 = arith.constant 0 : index
    %142 = vector.load %arg19[%c128_172, %c0_173] : memref<144x16xf32, #tpu.memory_space<vmem>>, vector<16x16xf32>
    tpu.vector_store %arg19[%c128_172, %c0_173], %141 {strides = array<i32>} : memref<144x16xf32, #tpu.memory_space<vmem>>, vector<16x16xf32>,
    %c0_174 = arith.constant 0 : index
    %c0_175 = arith.constant 0 : index
    %143 = vector.load %arg19[%c0_174, %c0_175] : memref<144x16xf32, #tpu.memory_space<vmem>>, vector<144x16xf32>
    %cst_176 = arith.constant dense<0.000000e+00> : vector<16x16xf32>
    %144 = tpu.matmul %106, %143, %cst_176 {dimension_numbers = #tpu.dot_dimension_numbers<[1], [0], [0], [1], [0, 0, 1, 1], [], []>} : vector<16x144xf32>, vector<144x16xf32>, vector<16x16xf32> -> vector<16x16xf32>
    %cst_177 = arith.constant 0.000000e+00 : f32
    %145 = vector.broadcast %cst_177 : f32 to vector<16x16xf32>
    %146 = arith.maximumf %144, %145 : vector<16x16xf32>
    %cst_178 = arith.constant 0.000000e+00 : f32
    %147 = vector.broadcast %cst_178 : f32 to vector<16x144xf32>
    %c0_179 = arith.constant 0 : index
    %c0_180 = arith.constant 0 : index
    %148 = vector.load %arg20[%c0_179, %c0_180] : memref<16x144xf32, #tpu.memory_space<vmem>>, vector<16x144xf32>
    tpu.vector_store %arg20[%c0_179, %c0_180], %147 {strides = array<i32>} : memref<16x144xf32, #tpu.memory_space<vmem>>, vector<16x144xf32>,
    %c0_181 = arith.constant 0 : index
    %c0_182 = arith.constant 0 : index
    %149 = vector.load %arg20[%c0_181, %c0_182] : memref<16x144xf32, #tpu.memory_space<vmem>>, vector<16x16xf32>
    tpu.vector_store %arg20[%c0_181, %c0_182], %146 {strides = array<i32>} : memref<16x144xf32, #tpu.memory_space<vmem>>, vector<16x16xf32>,
    %c0_183 = arith.constant 0 : index
    %c1_184 = arith.constant 1 : index
    %150 = vector.load %arg20[%c0_183, %c1_184] : memref<16x144xf32, #tpu.memory_space<vmem>>, vector<16x16xf32>
    %151 = arith.maximumf %146, %150 : vector<16x16xf32>
    %c0_185 = arith.constant 0 : index
    %c4 = arith.constant 4 : index
    %152 = vector.load %arg20[%c0_185, %c4] : memref<16x144xf32, #tpu.memory_space<vmem>>, vector<16x16xf32>
    %c0_186 = arith.constant 0 : index
    %c5 = arith.constant 5 : index
    %153 = vector.load %arg20[%c0_186, %c5] : memref<16x144xf32, #tpu.memory_space<vmem>>, vector<16x16xf32>
    %154 = arith.maximumf %152, %153 : vector<16x16xf32>
    %155 = arith.maximumf %151, %154 : vector<16x16xf32>
    %c0_187 = arith.constant 0 : index
    %c0_188 = arith.constant 0 : index
    %156 = vector.load %arg10[%c0_187, %c0_188] : memref<16x4xf32, #tpu.memory_space<vmem>>, vector<16x4xf32>
    %cst_189 = arith.constant dense<0.000000e+00> : vector<16x4xf32>
    %157 = tpu.matmul %155, %156, %cst_189 {dimension_numbers = #tpu.dot_dimension_numbers<[1], [0], [0], [1], [0, 0, 1, 1], [], []>} : vector<16x16xf32>, vector<16x4xf32>, vector<16x4xf32> -> vector<16x4xf32>
    %c0_190 = arith.constant 0 : index
    %c0_191 = arith.constant 0 : index
    %c0_192 = arith.constant 0 : index
    %158 = vector.load %arg11[%c0_190, %c0_191, %c0_192] : memref<1x16x4xf32, #tpu.memory_space<vmem>>, vector<1x16x4xf32>
    %159 = vector.shape_cast %158 : vector<1x16x4xf32> to vector<16x4xf32>
    %160 = vector.shape_cast %157 : vector<16x4xf32> to vector<1x16x4xf32>
    tpu.vector_store %arg11[%c0_190, %c0_191, %c0_192], %160 {strides = array<i32>} : memref<1x16x4xf32, #tpu.memory_space<vmem>>, vector<1x16x4xf32>,
    return
  }
  func.func @transform_0(%arg0: i32) -> (i32, i32, i32) {
    %c0_i32 = arith.constant 0 : i32
    %c0_i32_0 = arith.constant 0 : i32
    %c0_i32_1 = arith.constant 0 : i32
    return %arg0, %c0_i32, %c0_i32_0 : i32, i32, i32
  }
  func.func @transform_1(%arg0: i32) -> (i32, i32) {
    %c0_i32 = arith.constant 0 : i32
    %c0_i32_0 = arith.constant 0 : i32
    %c0_i32_1 = arith.constant 0 : i32
    return %c0_i32, %c0_i32_0 : i32, i32
  }
  func.func @transform_2(%arg0: i32) -> (i32, i32) {
    %c0_i32 = arith.constant 0 : i32
    %c0_i32_0 = arith.constant 0 : i32
    %c0_i32_1 = arith.constant 0 : i32
    return %c0_i32, %c0_i32_0 : i32, i32
  }
  func.func @transform_3(%arg0: i32) -> (i32, i32) {
    %c0_i32 = arith.constant 0 : i32
    %c0_i32_0 = arith.constant 0 : i32
    %c0_i32_1 = arith.constant 0 : i32
    return %c0_i32, %c0_i32_0 : i32, i32
  }
  func.func @transform_4(%arg0: i32) -> (i32, i32) {
    %c0_i32 = arith.constant 0 : i32
    %c0_i32_0 = arith.constant 0 : i32
    %c0_i32_1 = arith.constant 0 : i32
    return %c0_i32, %c0_i32_0 : i32, i32
  }
  func.func @transform_5(%arg0: i32) -> (i32, i32) {
    %c0_i32 = arith.constant 0 : i32
    %c0_i32_0 = arith.constant 0 : i32
    %c0_i32_1 = arith.constant 0 : i32
    return %c0_i32, %c0_i32_0 : i32, i32
  }
  func.func @transform_6(%arg0: i32) -> (i32, i32) {
    %c0_i32 = arith.constant 0 : i32
    %c0_i32_0 = arith.constant 0 : i32
    %c0_i32_1 = arith.constant 0 : i32
    return %c0_i32, %c0_i32_0 : i32, i32
  }
  func.func @transform_7(%arg0: i32) -> (i32, i32) {
    %c0_i32 = arith.constant 0 : i32
    %c0_i32_0 = arith.constant 0 : i32
    %c0_i32_1 = arith.constant 0 : i32
    return %c0_i32, %c0_i32_0 : i32, i32
  }
  func.func @transform_8(%arg0: i32) -> (i32, i32) {
    %c0_i32 = arith.constant 0 : i32
    %c0_i32_0 = arith.constant 0 : i32
    %c0_i32_1 = arith.constant 0 : i32
    return %c0_i32, %c0_i32_0 : i32, i32
  }
  func.func @transform_9(%arg0: i32) -> (i32, i32) {
    %c0_i32 = arith.constant 0 : i32
    %c0_i32_0 = arith.constant 0 : i32
    %c0_i32_1 = arith.constant 0 : i32
    return %c0_i32, %c0_i32_0 : i32, i32
  }
  func.func @transform_10(%arg0: i32) -> (i32, i32, i32) {
    %c0_i32 = arith.constant 0 : i32
    %c0_i32_0 = arith.constant 0 : i32
    %c0_i32_1 = arith.constant 0 : i32
    return %arg0, %c0_i32, %c0_i32_0 : i32, i32, i32
  }
}

</mosaic_0001>

<bundles_post_ra>
// kernel: encoder_forward.1
= control target key start
LH: loop header
LB: loop body
LE: loop exit
PB: predicated region body
PF: predicated region fallthrough
CT: control target
= control target key end

     0   :  { %s2152_s13 = smov 0   ;;  %s2700_s0 = inlined_call_operand.vmem [shape: f32[2,8,256], index: 0, kind: input, shape index: {}]   ;;  %s2701_s1 = inlined_call_operand.vmem [shape: f32[8,72], index: 1, kind: input, shape index: {}]   ;;  %s2702_s2 = inlined_call_operand.vmem [shape: f32[16,72], index: 2, kind: input, shape index: {}]   ;;  %s2703_s3 = inlined_call_operand.vmem [shape: f32[16,144], index: 3, kind: input, shape index: {}]   ;;  %s2704_s4 = inlined_call_operand.vmem [shape: f32[72,256], index: 4, kind: input, shape index: {}]   ;;  %s2705_s5 = inlined_call_operand.vmem [shape: f32[72,64], index: 5, kind: input, shape index: {}]   ;;  %s2706_s6 = inlined_call_operand.vmem [shape: f32[144,16], index: 6, kind: input, shape index: {}]   ;;  %s2707_s7 = inlined_call_operand.vmem [shape: f32[256,64], index: 7, kind: input, shape index: {}]   ;;  %s2708_s8 = inlined_call_operand.vmem [shape: f32[64,16], index: 8, kind: input, shape index: {}]   ;;  %s2709_s9 = inlined_call_operand.vmem [shape: f32[16,4], index: 9, kind: input, shape index: {}]   ;;  %s2710_s10 = inlined_call_operand.vmem [shape: f32[2,16,4], index: 10, kind: output, shape index: {}]  }
   0x1 LB: > { %s1752_s14 = sadd.s32 4294967295, %s2073_s13   ;;  %p1756_p0 = scmp.ge.s32.totalorder %s2073_s13, 1  ;;  %s2073_s13 = sphi %s2152_s13, %s20_s13  }
   0x2   : > { %p312_p1 = scmp.lt.s32.totalorder %s2073_s13, 3 }
   0x4   : > { %p313_p2 = pnand %p1756_p0, %p312_p1 }
   0x5   : > { %v407_v0 = vld [vmem:[%s2704_s4 + $0x10] sm:$0xff] (!%p313_p2)  ;;  %v372_v1 = vld [vmem:[%s2704_s4] sm:$0xff] (!%p313_p2)  ;;  %s2075_s19 = smov (!%p313_p2), 112   ;;  %s2076_s20 = smov (!%p313_p2), 111   ;;  %v408_v2 = vld [vmem:[%s2704_s4 + $0x18] sm:$0xff] (!%p313_p2)  ;;  %vm380_vm0 = vcmask (!%p313_p2), 908288  }
   0x6   : > { %316 = sbr.rel (%p313_p2) target bundleno = 2646 (0xa56), region = 60  ;;  %411 = vrot.lane.b32.xlu1 (!%p313_p2), %v407_v0, %s2075_s19  ;;  %376 = vrot.lane.b32.xlu0 (!%p313_p2), %v372_v1, %s2076_s20  ;;  %v373_v3 = vld [vmem:[%s2704_s4 + $0x8] sm:$0xff] (!%p313_p2)  ;;  %v442_v5 = vld [vmem:[%s2704_s4 + $0x20] sm:$0xff] (!%p313_p2)  ;;  %s2077_s29 = smov (!%p313_p2), 113   ;;  %vm415_vm1 = vcmask (!%p313_p2), 916480   ;;  %vm450_vm2 = vcmask (!%p313_p2), 924672  }
   0x7   : > { %v443_v4 = vld [vmem:[%s2704_s4 + $0x28] sm:$0xff] (!%p313_p2)  ;;  %v478_v6 = vld [vmem:[%s2704_s4 + $0x38] sm:$0xff] (!%p313_p2)  ;;  %v477_v7 = vld [vmem:[%s2704_s4 + $0x30] sm:$0xff] (!%p313_p2)  ;;  %s2078_s16 = smov (!%p313_p2), 127   ;;  %s2079_s23 = smov (!%p313_p2), 1   ;;  %vm485_vm3 = vcmask (!%p313_p2), 1039360  }
   0x8   : > { %v515_v8 = vld [vmem:[%s2704_s4 + $0x58] sm:$0xff] (!%p313_p2)  ;;  %v514_v9 = vld [vmem:[%s2704_s4 + $0x50] sm:$0xff] (!%p313_p2)  ;;  %v548_v10 = vld [vmem:[%s2704_s4 + $0x68] sm:$0xff] (!%p313_p2)  ;;  %s2080_s28 = smov (!%p313_p2), 15   ;;  %s2081_s17 = smov (!%p313_p2), 16   ;;  %vm502_vm4 = vcmask (!%p313_p2), 7168  }
   0x9   : > { %v547_v11 = vld [vmem:[%s2704_s4 + $0x60] sm:$0xff] (!%p313_p2)  ;;  %v581_v12 = vld [vmem:[%s2704_s4 + $0x78] sm:$0xff] (!%p313_p2)  ;;  %v580_v13 = vld [vmem:[%s2704_s4 + $0x70] sm:$0xff] (!%p313_p2)  ;;  %s2082_s25 = smov (!%p313_p2), 17   ;;  %p350_p3 = scmp.lt.s32.totalorder (!%p313_p2), %s1752_s14, 1  ;;  %vm467_vm5 = vcmask (!%p313_p2), 121856  }
   0xa   : > { %413 = vrot.lane.b32.xlu1 (!%p313_p2), %v408_v2, %s2075_s19  ;;  %378 = vrot.lane.b32.xlu0 (!%p313_p2), %v373_v3, %s2076_s20  ;;  %v614_v14 = vld [vmem:[%s2704_s4 + $0x88] sm:$0xff] (!%p313_p2)  ;;  %v613_v15 = vld [vmem:[%s2704_s4 + $0x80] sm:$0xff] (!%p313_p2)  ;;  %vm432_vm6 = vcmask (!%p313_p2), 130048   ;;  %vm397_vm7 = vcmask (!%p313_p2), 138240   ;;  %vm661_vm8 = vcmask (!%p313_p2), 588800   ;;  %s2085_s12 = smov (!%p313_p2), 119  }
   0xb   : > { %s2086_s21 = smov (!%p313_p2), 121   ;;  %s2089_s15 = smov (!%p313_p2), 8   ;;  %vm886_vm9 = vcmask (!%p313_p2), 523264   ;;  %vm904_vm10 = vcmask (!%p313_p2), 72704   ;;  %vm923_vm11 = vcmask (!%p313_p2), 64512   ;;  %vm942_vm12 = vcmask (!%p313_p2), 56320  }
   0xc   : > { %s2092_s22 = smov (!%p313_p2), 125   ;;  %s2093_s24 = smov (!%p313_p2), 3   ;;  %vm1266_vm13 = vcmask (!%p313_p2), 39936   ;;  %vm1303_vm14 = vcmask (!%p313_p2), 31744   ;;  %vm1340_vm15 = vcmask (!%p313_p2), 23552  }
   0xd   : > { %s2712_s14 = smov (!%p350_p3, %s1752_s14), 1  ;;  %s2095_s18 = smov 5  }
   0xe   : > { %448 = vrot.lane.b32.xlu1 %v443_v4, %s2077_s29  ;;  %446 = vrot.lane.b32.xlu0 %v442_v5, %s2077_s29  ;;  %s1772_s26 = sshll.u32 %s2712_s14, 4  ;;  %v2083_v5 = vmov 0.0  }
   0xf   : > { %s354_s11 = scalar_lea.vmem %s2700_s0, %s1772_s26  ;;  %729 = vmatprep.mubr.f32.mxu1 %v2083_v5  ;;  %885 = vst [vmem:[#allocation5 + $0x8] sm:$0xff] %v2083_v5  ;;  %1105 = vst [vmem:[#allocation7] sm:$0xff] %v2083_v5 }
  0x10   : > { %v2238_v22 = vld [vmem:[%s354_s11] sm:$0xff]  ;;  %v2240_v23 = vld [vmem:[%s354_s11 + $0x8] sm:$0xff]  ;;  %1107 = vst [vmem:[#allocation7 + $0x10] sm:$0xff] %v2083_v5  ;;  %1229 = vst [vmem:[#allocation8 + $0x8] sm:$0xff] %v2083_v5  ;;  %s2090_s11 = smov 123  }
  0x11   : > { %1232 = vst [vmem:[#allocation8 + $0x20] sm:$0xff] %v2083_v5  ;;  %1582 = vst [vmem:[#allocation10] sm:$0xff] %v2083_v5 }
  0x12   : > { %483 = vrot.lane.b32.xlu1 %v478_v6, %s2078_s16  ;;  %481 = vrot.lane.b32.xlu0 %v477_v7, %s2078_s16  ;;  %1584 = vst [vmem:[#allocation10 + $0x10] sm:$0xff] %v2083_v5 }
  0x16   : > { %520 = vrot.lane.b32.xlu1 %v515_v8, %s2079_s23  ;;  %518 = vrot.lane.b32.xlu0 %v514_v9, %s2079_s23 }
  0x1a   : > { %553 = vrot.lane.b32.xlu1 %v548_v10, %s2080_s28  ;;  %551 = vrot.lane.b32.xlu0 %v547_v11, %s2080_s28 }
  0x1e   : > { %586 = vrot.lane.b32.xlu1 %v581_v12, %s2081_s17  ;;  %584 = vrot.lane.b32.xlu0 %v580_v13, %s2081_s17 }
  0x22   : > { %619 = vrot.lane.b32.xlu1 %v614_v14, %s2082_s25  ;;  %617 = vrot.lane.b32.xlu0 %v613_v15, %s2082_s25 }
  0x78   : > { %v412_v16 = vpop.permute.xlu1 %411  ;;  %v377_v17 = vpop.permute.xlu0 %376 }
  0x79   : > { %v420_v18 = vmul.f32 0.0, %v412_v16  ;;  %v385_v19 = vmul.f32 0.0, %v377_v17 }
  0x7b   : > { %391 = vrot.lane.b32.xlu0 %v385_v19, %s2082_s25  ;;  %426 = vrot.lane.b32.xlu1 %v420_v18, %s2081_s17 }
  0x7c   : > { %v414_v20 = vpop.permute.xlu1 %413  ;;  %v379_v21 = vpop.permute.xlu0 %378 }
  0x7d   : > { %v381_v24 = vsel %vm380_vm0, %v377_v17, %v379_v21  ;;  %v416_v27 = vsel %vm415_vm1, %v412_v16, %v414_v20  ;;  %v387_v29 = vmul.f32 %v379_v21, %v2240_v23  ;;  %v422_v33 = vmul.f32 %v414_v20, %v2240_v23 }
  0x7e   : > { %v386_v28 = vmul.f32 %v381_v24, %v2238_v22  ;;  %v421_v32 = vmul.f32 %v416_v27, %v2238_v22 }
  0x80   : > { %v449_v25 = vpop.permute.xlu1 %448  ;;  %v447_v26 = vpop.permute.xlu0 %446  ;;  %v2022_v39 = vpack.i.bf16 %v387_v29, %v386_v28  ;;  %v2027_v43 = vpack.i.bf16 %v422_v33, %v421_v32 }
  0x81   : > { %v455_v30 = vmul.f32 0.0, %v447_v26  ;;  %v451_v31 = vsel %vm450_vm2, %v447_v26, %v449_v25  ;;  %v457_v36 = vmul.f32 %v449_v25, %v2240_v23 }
  0x82   : > { %v456_v37 = vmul.f32 %v451_v31, %v2238_v22 }
  0x83   : > { %461 = vrot.lane.b32.xlu0 %v455_v30, %s2080_s28 }
  0x84   : > { %v484_v34 = vpop.permute.xlu1 %483  ;;  %v482_v35 = vpop.permute.xlu0 %481  ;;  %v2032_v47 = vpack.i.bf16 %v457_v36, %v456_v37 }
  0x85   : > { %v490_v38 = vmul.f32 0.0, %v482_v35  ;;  %v486_v40 = vsel %vm485_vm3, %v482_v35, %v484_v34  ;;  %v492_v44 = vmul.f32 %v484_v34, %v2240_v23 }
  0x86   : > { %v491_v45 = vmul.f32 %v486_v40, %v2238_v22 }
  0x87   : > { %496 = vrot.lane.b32.xlu1 %v490_v38, %s2079_s23  ;;  %2023 = vrot.lane.b32.xlu0 %v2022_v39, %s2082_s25  ;;  %s2087_s25 = smov 7  }
  0x88   : > { %v521_v41 = vpop.permute.xlu1 %520  ;;  %v519_v42 = vpop.permute.xlu0 %518  ;;  %v2037_v53 = vpack.i.bf16 %v492_v44, %v491_v45 }
  0x89   : > { %v522_v46 = vsel %vm502_vm4, %v519_v42, %v521_v41  ;;  %v528_v48 = vmul.f32 0.0, %v521_v41  ;;  %v526_v55 = vmul.f32 %v519_v42, %v2238_v22 }
  0x8a   : > { %v527_v49 = vmul.f32 %v522_v46, %v2240_v23 }
  0x8b   : > { %2028 = vrot.lane.b32.xlu1 %v2027_v43, %s2081_s17  ;;  %2033 = vrot.lane.b32.xlu0 %v2032_v47, %s2080_s28  ;;  %s2088_s28 = smov 9  }
  0x8c   : > { %v554_v50 = vpop.permute.xlu1 %553  ;;  %v552_v51 = vpop.permute.xlu0 %551  ;;  %v2042_v58 = vpack.i.bf16 %v528_v48, %v527_v49 }
  0x8d   : > { %v559_v52 = vmul.f32 %v552_v51, %v2238_v22  ;;  %v555_v54 = vsel %vm467_vm5, %v552_v51, %v554_v50  ;;  %v561_v59 = vmul.f32 0.0, %v554_v50 }
  0x8e   : > { %v560_v60 = vmul.f32 %v555_v54, %v2240_v23 }
  0x8f   : > { %2038 = vrot.lane.b32.xlu1 %v2037_v53, %s2079_s23  ;;  %565 = vrot.lane.b32.xlu0 %v559_v52, %s2077_s29 }
  0x90   : > { %v587_v56 = vpop.permute.xlu1 %586  ;;  %v585_v57 = vpop.permute.xlu0 %584  ;;  %v2047_v4 = vpack.i.bf16 %v561_v59, %v560_v60 }
  0x91   : > { %v594_v61 = vmul.f32 0.0, %v587_v56  ;;  %v588_v62 = vsel %vm432_vm6, %v585_v57, %v587_v56  ;;  %v592_v7 = vmul.f32 %v585_v57, %v2238_v22 }
  0x92   : > { %v593_v63 = vmul.f32 %v588_v62, %v2240_v23 }
  0x93   : > { %532 = vrot.lane.b32.xlu1 %v526_v55, %s2078_s16  ;;  %2043 = vrot.lane.b32.xlu0 %v2042_v58, %s2078_s16 }
  0x94   : > { %v620_v0 = vpop.permute.xlu1 %619  ;;  %v618_v1 = vpop.permute.xlu0 %617  ;;  %v2052_v2 = vpack.i.bf16 %v594_v61, %v593_v63 }
  0x95   : > { %v621_v3 = vsel %vm397_vm7, %v618_v1, %v620_v0  ;;  %v627_v8 = vmul.f32 0.0, %v620_v0  ;;  %v625_v9 = vmul.f32 %v618_v1, %v2238_v22  ;;  %v362_v0 = vld [vmem:[%s2701_s1] sm:$0xff] }
  0x96   : > { %v626_v6 = vmul.f32 %v621_v3, %v2240_v23  ;;  %v796_v3 = vld [vmem:[%s2707_s7 + $0x80] sm:$0xff] }
  0x97   : > { %2053 = vrot.lane.b32.xlu1 %v2052_v2, %s2075_s19  ;;  %2048 = vrot.lane.b32.xlu0 %v2047_v4, %s2077_s29  ;;  %v797_v4 = vld [vmem:[%s2707_s7 + $0x88] sm:$0xff] }
  0x9b   : > { %598 = vrot.lane.b32.xlu1 %v592_v7, %s2075_s19  ;;  %633 = vrot.lane.b32.xlu0 %v626_v6, %s2076_s20  ;;  %v780_v6 = vld [vmem:[%s2707_s7] sm:$0xff] }
  0x9f   : > { %635 = vrot.lane.b32.xlu1 %v627_v8, %s2076_s20  ;;  %631 = vrot.lane.b32.xlu0 %v625_v9, %s2076_s20  ;;  %v1897_v9 = vpack.c.bf16 %v797_v4, %v796_v3  ;;  %v891_v3 = vld [vmem:[%s2705_s5] sm:$0xff]  ;;  %s2084_s20 = smov 120   ;;  %v929_v4 = vld [vmem:[%s2705_s5 + $0x10] sm:$0xff] }
  0xed   : > { %v392_v10 = vpop.permute.xlu0 %391  ;;  %v427_v11 = vpop.permute.xlu1 %426 }
  0xf5   : > { %v462_v12 = vpop.permute.xlu0 %461 }
  0xf9   : > { %v497_v13 = vpop.permute.xlu1 %496  ;;  %v2024_v14 = vpop.permute.xlu0 %2023 }
  0xfa   : > { %v2026_v15 = vunpack.i.h.bf16 %v2024_v14  ;;  %v2025_v16 = vunpack.i.l.bf16 %v2024_v14 }
  0xfc   : > { %v399_v21 = vsel %vm397_vm7, %v2025_v16, %v2026_v15  ;;  %v398_v24 = vsel %vm397_vm7, %v392_v10, %v2025_v16  ;;  %v781_v10 = vld [vmem:[%s2707_s7 + $0x8] sm:$0xff]  ;;  %v782_v16 = vld [vmem:[%s2707_s7 + $0x10] sm:$0xff] }
  0xfd   : > { %v2029_v17 = vpop.permute.xlu1 %2028  ;;  %v2034_v18 = vpop.permute.xlu0 %2033  ;;  %v1899_v14 = vpack.c.bf16 %v781_v10, %v780_v6  ;;  %v978_v6 = vld [vmem:[%s2705_s5 + $0x30] sm:$0xff] }
  0xfe   : > { %v2031_v19 = vunpack.i.h.bf16 %v2029_v17  ;;  %v2030_v20 = vunpack.i.l.bf16 %v2029_v17  ;;  %v2036_v25 = vunpack.i.h.bf16 %v2034_v18  ;;  %v2035_v26 = vunpack.i.l.bf16 %v2034_v18  ;;  %v783_v17 = vld [vmem:[%s2707_s7 + $0x18] sm:$0xff]  ;;  %v800_v18 = vld [vmem:[%s2707_s7 + $0xa0] sm:$0xff] }
 0x100   : > { %v434_v27 = vsel %vm432_vm6, %v2030_v20, %v2031_v19  ;;  %v433_v28 = vsel %vm432_vm6, %v427_v11, %v2030_v20  ;;  %v469_v35 = vsel %vm467_vm5, %v2035_v26, %v2036_v25  ;;  %v468_v37 = vsel %vm467_vm5, %v462_v12, %v2035_v26  ;;  %v798_v11 = vld [vmem:[%s2707_s7 + $0x90] sm:$0xff]  ;;  %v799_v12 = vld [vmem:[%s2707_s7 + $0x98] sm:$0xff]  ;;  %v801_v19 = vld [vmem:[%s2707_s7 + $0xa8] sm:$0xff] }
 0x101   : > { %v2039_v29 = vpop.permute.xlu1 %2038  ;;  %v566_v30 = vpop.permute.xlu0 %565  ;;  %v1881_v31 = vpack.c.bf16 %v434_v27, %v399_v21  ;;  %v1883_v32 = vpack.c.bf16 %v433_v28, %v398_v24  ;;  %v1901_v15 = vpack.c.bf16 %v799_v12, %v798_v11  ;;  %v1903_v21 = vpack.c.bf16 %v783_v17, %v782_v16  ;;  %v784_v25 = vld [vmem:[%s2707_s7 + $0x20] sm:$0xff]  ;;  %v785_v26 = vld [vmem:[%s2707_s7 + $0x28] sm:$0xff]  ;;  %v802_v27 = vld [vmem:[%s2707_s7 + $0xb0] sm:$0xff] }
 0x102   : > { %v2041_v33 = vunpack.i.h.bf16 %v2039_v29  ;;  %v2040_v34 = vunpack.i.l.bf16 %v2039_v29  ;;  %v1905_v24 = vpack.c.bf16 %v801_v19, %v800_v18  ;;  %v1907_v28 = vpack.c.bf16 %v785_v26, %v784_v25 }
 0x103   : > { %1882 = vmatprep.subr.bf16.mxu1 %v1881_v31  ;;  %v787_v31 = vld [vmem:[%s2707_s7 + $0x38] sm:$0xff] }
 0x104   : > { %1884 = vmatpush1.bf16.msra.mxu1 %v1883_v32  ;;  %v504_v36 = vsel %vm502_vm4, %v2040_v34, %v2041_v33  ;;  %v503_v38 = vsel %vm502_vm4, %v497_v13, %v2040_v34  ;;  %v804_v32 = vld [vmem:[%s2707_s7 + $0xc0] sm:$0xff]  ;;  %v805_v33 = vld [vmem:[%s2707_s7 + $0xc8] sm:$0xff] }
 0x105   : > { %v533_v39 = vpop.permute.xlu1 %532  ;;  %v2044_v40 = vpop.permute.xlu0 %2043  ;;  %v1885_v41 = vpack.c.bf16 %v504_v36, %v469_v35  ;;  %v1887_v42 = vpack.c.bf16 %v503_v38, %v468_v37  ;;  %v1913_v35 = vpack.c.bf16 %v805_v33, %v804_v32  ;;  %v788_v36 = vld [vmem:[%s2707_s7 + $0x40] sm:$0xff]  ;;  %v789_v37 = vld [vmem:[%s2707_s7 + $0x48] sm:$0xff]  ;;  %v806_v38 = vld [vmem:[%s2707_s7 + $0xd0] sm:$0xff] }
 0x106   : > { %v2046_v43 = vunpack.i.h.bf16 %v2044_v40  ;;  %v2045_v44 = vunpack.i.l.bf16 %v2044_v40  ;;  %v1915_v40 = vpack.c.bf16 %v789_v37, %v788_v36 }
 0x107   : > { %1886 = vmatprep.subr.bf16.mxu1 %v1885_v41 }
 0x108   : > { %1888 = vmatpush1.bf16.msra.mxu1 %v1887_v42  ;;  %v539_v45 = vsel %vm485_vm3, %v2045_v44, %v2046_v43  ;;  %v538_v46 = vsel %vm485_vm3, %v533_v39, %v2045_v44  ;;  %v807_v39 = vld [vmem:[%s2707_s7 + $0xd8] sm:$0xff]  ;;  %v790_v42 = vld [vmem:[%s2707_s7 + $0x50] sm:$0xff] }
 0x109   : > { %v2054_v47 = vpop.permute.xlu1 %2053  ;;  %v2049_v48 = vpop.permute.xlu0 %2048  ;;  %v1889_v49 = vpack.c.bf16 %v539_v45, %v2240_v23  ;;  %v1891_v50 = vpack.c.bf16 %v538_v46, %v2238_v22  ;;  %v1917_v41 = vpack.c.bf16 %v807_v39, %v806_v38  ;;  %v791_v43 = vld [vmem:[%s2707_s7 + $0x58] sm:$0xff]  ;;  %v808_v45 = vld [vmem:[%s2707_s7 + $0xe0] sm:$0xff]  ;;  %v809_v46 = vld [vmem:[%s2707_s7 + $0xe8] sm:$0xff] }
 0x10a   : > { %v2056_v51 = vunpack.i.h.bf16 %v2054_v47  ;;  %v2055_v52 = vunpack.i.l.bf16 %v2054_v47  ;;  %v2051_v53 = vunpack.i.h.bf16 %v2049_v48  ;;  %v2050_v54 = vunpack.i.l.bf16 %v2049_v48  ;;  %v792_v48 = vld [vmem:[%s2707_s7 + $0x60] sm:$0xff] }
 0x10b   : > { %1890 = vmatprep.subr.bf16.mxu1 %v1889_v49  ;;  %v1919_v44 = vpack.c.bf16 %v791_v43, %v790_v42  ;;  %v1921_v47 = vpack.c.bf16 %v809_v46, %v808_v45  ;;  %v793_v49 = vld [vmem:[%s2707_s7 + $0x68] sm:$0xff]  ;;  %v882_v43 = vld [vmem:[%s2702_s2] sm:$0xff] }
 0x10c   : > { %1892 = vmatpush1.bf16.msra.mxu1 %v1891_v50  ;;  %v572_v55 = vsel %vm450_vm2, %v2050_v54, %v2051_v53  ;;  %v605_v56 = vsel %vm415_vm1, %v2055_v52, %v2056_v51  ;;  %v571_v60 = vsel %vm450_vm2, %v566_v30, %v2050_v54  ;;  %v786_v30 = vld [vmem:[%s2707_s7 + $0x30] sm:$0xff]  ;;  %v1923_v50 = vpack.c.bf16 %v793_v49, %v792_v48 }
 0x10d   : > { %v599_v57 = vpop.permute.xlu1 %598  ;;  %v634_v58 = vpop.permute.xlu0 %633  ;;  %v1893_v59 = vpack.c.bf16 %v605_v56, %v572_v55  ;;  %v1911_v34 = vpack.c.bf16 %v787_v31, %v786_v30  ;;  %v810_v51 = vld [vmem:[%s2707_s7 + $0xf0] sm:$0xff]  ;;  %v795_v55 = vld [vmem:[%s2707_s7 + $0x78] sm:$0xff]  ;;  %1852 = vmatprep.mubr.msk.f32.mxu0 %vm661_vm8, %v882_v43  ;;  %v1411_v43 = vld [vmem:[%s2706_s6 + $0x60] sm:$0xff] }
 0x10e   : > { %v604_v61 = vsel %vm415_vm1, %v599_v57, %v2055_v52  ;;  %v811_v52 = vld [vmem:[%s2707_s7 + $0xf8] sm:$0xff]  ;;  %v794_v54 = vld [vmem:[%s2707_s7 + $0x70] sm:$0xff] }
 0x10f   : > { %v1895_v23 = vpack.c.bf16 %v604_v61, %v571_v60  ;;  %1894 = vmatprep.subr.bf16.mxu1 %v1893_v59  ;;  %v1925_v53 = vpack.c.bf16 %v811_v52, %v810_v51  ;;  %v1927_v56 = vpack.c.bf16 %v795_v55, %v794_v54 }
 0x111   : > { %v636_v22 = vpop.permute.xlu1 %635  ;;  %v632_v62 = vpop.permute.xlu0 %631  ;;  %1896 = vmatpush1.bf16.msra.mxu1 %v1895_v23 }
 0x112   : > { %v638_v63 = vsel %vm380_vm0, %v634_v58, %v636_v22  ;;  %v637_v1 = vsel %vm380_vm0, %v632_v62, %v634_v58 }
 0x113   : > { %681 = vmatprep.subr.mxu1 %v638_v63 }
 0x115   : > { %682 = vmatpush1.msra.mxu1 %v637_v1  ;;  %v910_v1 = vld [vmem:[%s2705_s5 + $0x8] sm:$0xff] }
 0x116   : > { %1761 = vmatmul.mubr.msk.f32.vlgmr.msra.gmra.mrb[0].mxu1 %vm661_vm8, %v362_v0  ;;  %1898 = vmatprep.subr.bf16.mxu1 %v1897_v9  ;;  %v990_v9 = vld [vmem:[%s2705_s5 + $0x38] sm:$0xff] }
 0x117   : > { %1900 = vmatpush3.bf16.msra.mxu1 %v1899_v14 }
 0x118   : > { %1902 = vmatprep.subr.bf16.mxu1 %v1901_v15 }
 0x11b   : > { %1904 = vmatpush3.bf16.msra.mxu1 %v1903_v21 }
 0x11c   : > { %1906 = vmatprep.subr.bf16.mxu1 %v1905_v24 }
 0x11f   : > { %1908 = vmatpush3.bf16.msra.mxu1 %v1907_v28 }
 0x1e9   : > { %v2311_v2 = vpop.f32.mrb[0].mxu1 }
 0x1ea   : > { %v736_v7 = vmax.f32 %v2311_v2, 0.0  ;;  %v2323_v8 = vpop.f32.mrb[1].mxu1  ;;  %v948_v2 = vld [vmem:[%s2705_s5 + $0x18] sm:$0xff] }
 0x1eb   : > { %v737_v13 = vmax.f32 %v2323_v8, 0.0  ;;  %v1002_v8 = vld [vmem:[%s2705_s5 + $0x40] sm:$0xff] }
 0x1ec   : > { %749 = vrot.lane.b32.xlu0 %v736_v7, %s2078_s16 }
 0x1ed   : > { %v2057_v20 = vpack.i.bf16 %v2083_v5, %v737_v13  ;;  %v803_v5 = vld [vmem:[%s2707_s7 + $0xb8] sm:$0xff] }
 0x1ee   : > { %v1909_v29 = vpack.c.bf16 %v803_v5, %v802_v27 }
 0x1ef   : > { %2058 = vrot.lane.b32.xlu1 %v2057_v20, %s2078_s16 }
 0x1f0   : > { %1910 = vmatprep.subr.bf16.mxu1 %v1909_v29 }
 0x1f1   : > { %1912 = vmatpush3.bf16.msra.mxu1 %v1911_v34 }
 0x1f2   : > { %1914 = vmatprep.subr.bf16.mxu1 %v1913_v35 }
 0x1f5   : > { %1916 = vmatpush3.bf16.msra.mxu1 %v1915_v40 }
 0x1f6   : > { %1918 = vmatprep.subr.bf16.mxu1 %v1917_v41 }
 0x1f9   : > { %1920 = vmatpush3.bf16.msra.mxu1 %v1919_v44 }
 0x1fa   : > { %1922 = vmatprep.subr.bf16.mxu1 %v1921_v47 }
 0x1fd   : > { %1924 = vmatpush3.bf16.msra.mxu1 %v1923_v50 }
 0x1fe   : > { %1926 = vmatprep.subr.bf16.mxu1 %v1925_v53 }
 0x201   : > { %1928 = vmatpush3.bf16.msra.mxu1 %v1927_v56 }
 0x25e   : > { %v750_v60 = vpop.permute.xlu0 %749 }
 0x261   : > { %v2059_v57 = vpop.permute.xlu1 %2058 }
 0x262   : > { %v2061_v58 = vunpack.i.h.bf16 %v2059_v57  ;;  %v2060_v59 = vunpack.i.l.bf16 %v2059_v57 }
 0x264   : > { %v764_v61 = vmax.f32 %v2061_v58, 0.0  ;;  %v756_v23 = vsel %vm485_vm3, %v2060_v59, %v2061_v58  ;;  %v755_v22 = vsel %vm485_vm3, %v750_v60, %v2060_v59 }
 0x265   : > { %v759_v62 = vmax.f32 %v736_v7, %v755_v22  ;;  %v760_v63 = vmax.f32 %v737_v13, %v756_v23  ;;  %v966_v7 = vld [vmem:[%s2705_s5 + $0x28] sm:$0xff] }
 0x267   : > { %768 = vrot.lane.b32.xlu0 %v759_v62, %s2075_s19  ;;  %v2062_v0 = vpack.i.bf16 %v764_v61, %v760_v63 }
 0x269   : > { %2063 = vrot.lane.b32.xlu1 %v2062_v0, %s2075_s19 }
 0x26b   : > { %912 = vrot.lane.b32.xlu0 %v910_v1, %s2084_s20 }
 0x26d   : > { %893 = vrot.lane.b32.xlu1 %v891_v3, %s2085_s12 }
 0x26f   : > { %950 = vrot.lane.b32.xlu0 %v948_v2, %s2078_s16 }
 0x271   : > { %931 = vrot.lane.b32.xlu1 %v929_v4, %s2086_s21 }
 0x273   : > { %980 = vrot.lane.b32.xlu0 %v978_v6, %s2087_s25 }
 0x275   : > { %968 = vrot.lane.b32.xlu1 %v966_v7, %s2079_s23 }
 0x277   : > { %1004 = vrot.lane.b32.xlu0 %v1002_v8, %s2088_s28  ;;  %v883_v8 = vld [vmem:[%s2702_s2 + $0x8] sm:$0xff] }
 0x279   : > { %992 = vrot.lane.b32.xlu1 %v990_v9, %s2089_s15 }
 0x2d9   : > { %v769_v10 = vpop.permute.xlu0 %768 }
 0x2db   : > { %v2064_v11 = vpop.permute.xlu1 %2063 }
 0x2dc   : > { %v2066_v12 = vunpack.i.h.bf16 %v2064_v11  ;;  %v2065_v13 = vunpack.i.l.bf16 %v2064_v11 }
 0x2dd   : > { %v913_v19 = vpop.permute.xlu0 %912 }
 0x2de   : > { %v774_v14 = vsel %vm415_vm1, %v769_v10, %v2065_v13  ;;  %v775_v15 = vsel %vm415_vm1, %v2065_v13, %v2066_v12  ;;  %v915_v21 = vmul.f32 0.0, %v913_v19  ;;  %v1135_v12 = vld [vmem:[%s2708_s8] sm:$0xff]  ;;  %v1136_v13 = vld [vmem:[%s2708_s8 + $0x8] sm:$0xff] }
 0x2df   : > { %v778_v16 = vmax.f32 %v759_v62, %v774_v14  ;;  %v779_v17 = vmax.f32 %v760_v63, %v775_v15  ;;  %v894_v18 = vpop.permute.xlu1 %893  ;;  %v1137_v14 = vld [vmem:[%s2708_s8 + $0x10] sm:$0xff] }
 0x2e0   : > { %v896_v20 = vmul.f32 0.0, %v894_v18 }
 0x2e1   : > { %876 = vmatprep.mubr.f32.mxu1 %v779_v17  ;;  %v951_v26 = vpop.permute.xlu0 %950  ;;  %v1138_v17 = vld [vmem:[%s2708_s8 + $0x18] sm:$0xff] }
 0x2e2   : > { %877 = vmatmul.mubr.f32.vlgmr.msra.gmra.mrb[2].mxu1 %v778_v16  ;;  %900 = vrot.lane.b32.xlu1 %v896_v20, %s2088_s28  ;;  %v953_v27 = vmul.f32 0.0, %v951_v26  ;;  %v1945_v16 = vpack.c.bf16 %v1136_v13, %v1135_v12  ;;  %v1140_v20 = vld [vmem:[%s2708_s8 + $0x28] sm:$0xff] }
 0x2e3   : > { %v932_v24 = vpop.permute.xlu1 %931 }
 0x2e4   : > { %v934_v25 = vmul.f32 0.0, %v932_v24  ;;  %1946 = vmatprep.subr.bf16.mxu1 %v1945_v16 }
 0x2e5   : > { %v981_v38 = vpop.permute.xlu0 %980  ;;  %1948 = vmatpush3.bf16.msra.mxu1 %v1945_v16 }
 0x2e6   : > { %919 = vrot.lane.b32.xlu1 %v915_v21, %s2089_s15 }
 0x2e7   : > { %v969_v30 = vpop.permute.xlu1 %968 }
 0x2e9   : > { %v1005_v41 = vpop.permute.xlu0 %1004 }
 0x2ea   : > { %938 = vrot.lane.b32.xlu1 %v934_v25, %s2087_s25 }
 0x2eb   : > { %v993_v33 = vpop.permute.xlu1 %992 }
 0x2ee   : > { %957 = vrot.lane.b32.xlu1 %v953_v27, %s2079_s23  ;;  %v1142_v27 = vld [vmem:[%s2708_s8 + $0x38] sm:$0xff] }
 0x354   : > { %v901_v44 = vpop.permute.xlu1 %900 }
 0x358   : > { %v920_v45 = vpop.permute.xlu1 %919 }
 0x35c   : > { %v939_v46 = vpop.permute.xlu1 %938 }
 0x360   : > { %v958_v47 = vpop.permute.xlu1 %957 }
 0x3b5   : > { %v1806_v5 = vpop.f32.mrb[2].mxu1 }
 0x3b6   : > { %v1807_v28 = vpop.f32.mrb[3].mxu1 }
 0x3b7   : > { %v1808_v29 = vadd.f32 %v1807_v28, %v1806_v5 }
 0x3b9   : > { %888 = vst.msk [vmem:[#allocation5 + $0x8] sm:$0xff] %vm886_vm9, %v1808_v29  ;;  %964 = vst.msk [vmem:[#allocation6 + $0x20] sm:$0xff] %vm886_vm9, %v1808_v29 }
 0x3c0   : > { %v928_v31 = vld [vmem:[#allocation5 + $0x8] sm:$0xff]  ;;  %v1017_v1 = vld [vmem:[#allocation6 + $0x20] sm:$0xff] }
 0x3c1   : > { %v971_v32 = vmul.f32 %v969_v30, %v928_v31  ;;  %v897_v34 = vmul.f32 %v928_v31, %v894_v18  ;;  %v995_v35 = vmul.f32 %v993_v33, %v928_v31  ;;  %v916_v36 = vmul.f32 %v928_v31, %v913_v19  ;;  %v1139_v19 = vld [vmem:[%s2708_s8 + $0x20] sm:$0xff] }
 0x3c2   : > { %v935_v37 = vmul.f32 %v932_v24, %v928_v31  ;;  %v954_v39 = vmul.f32 %v951_v26, %v928_v31  ;;  %v983_v40 = vmul.f32 %v981_v38, %v928_v31  ;;  %v1007_v42 = vmul.f32 %v1005_v41, %v928_v31  ;;  %v1141_v26 = vld [vmem:[%s2708_s8 + $0x30] sm:$0xff]  ;;  %v1240_v33 = vld [vmem:[%s2706_s6] sm:$0xff]  ;;  %v1352_v38 = vld [vmem:[%s2706_s6 + $0x38] sm:$0xff] }
 0x3c3   : > { %973 = vrot.lane.b32.xlu1 %v971_v32, %s2078_s16  ;;  %902 = vrot.lane.b32.xlu0 %v897_v34, %s2088_s28  ;;  %v1949_v18 = vpack.c.bf16 %v1138_v17, %v1137_v14  ;;  %v1953_v21 = vpack.c.bf16 %v1140_v20, %v1139_v19  ;;  %v1957_v5 = vpack.c.bf16 %v1142_v27, %v1141_v26  ;;  %v1241_v32 = vld [vmem:[%s2706_s6 + $0x8] sm:$0xff]  ;;  %v1278_v34 = vld [vmem:[%s2706_s6 + $0x18] sm:$0xff]  ;;  %s2094_s28 = smov 4   ;;  %v2096_v19 = vmov 0.0|0.0  }
 0x3c4   : > { %v1387_v41 = vld [vmem:[%s2706_s6 + $0x50] sm:$0xff] }
 0x3c5   : > { %1950 = vmatprep.subr.bf16.mxu1 %v1949_v18 }
 0x3c6   : > { %1952 = vmatpush3.bf16.msra.mxu1 %v1949_v18 }
 0x3c7   : > { %997 = vrot.lane.b32.xlu1 %v995_v35, %s2084_s20  ;;  %921 = vrot.lane.b32.xlu0 %v916_v36, %s2089_s15  ;;  %v1277_v35 = vld [vmem:[%s2706_s6 + $0x10] sm:$0xff]  ;;  %v1315_v36 = vld [vmem:[%s2706_s6 + $0x28] sm:$0xff] }
 0x3c8   : > { %1954 = vmatprep.subr.bf16.mxu1 %v1953_v21 }
 0x3ca   : > { %1956 = vmatpush3.bf16.msra.mxu1 %v1953_v21 }
 0x3cb   : > { %940 = vrot.lane.b32.xlu0 %v935_v37, %s2087_s25  ;;  %1958 = vmatprep.subr.bf16.mxu1 %v1957_v5  ;;  %v1314_v37 = vld [vmem:[%s2706_s6 + $0x20] sm:$0xff] }
 0x3ce   : > { %1960 = vmatpush3.bf16.msra.mxu1 %v1957_v5 }
 0x3cf   : > { %959 = vrot.lane.b32.xlu0 %v954_v39, %s2079_s23  ;;  %v1351_v39 = vld [vmem:[%s2706_s6 + $0x30] sm:$0xff] }
 0x3d3   : > { %985 = vrot.lane.b32.xlu0 %v983_v40, %s2086_s21  ;;  %v1388_v40 = vld [vmem:[%s2706_s6 + $0x58] sm:$0xff] }
 0x3d7   : > { %1009 = vrot.lane.b32.xlu0 %v1007_v42, %s2085_s12  ;;  %v1412_v42 = vld [vmem:[%s2706_s6 + $0x68] sm:$0xff]  ;;  %s359_s12 = scalar_lea.vmem %s2710_s10, %s1772_s26 }
 0x435   : > { %v974_v48 = vpop.permute.xlu1 %973  ;;  %v903_v49 = vpop.permute.xlu0 %902 }
 0x436   : > { %976 = vst.msk [vmem:[#allocation6 + $0x28] sm:$0xff] %vm886_vm9, %v974_v48  ;;  %v905_v50 = vsel %vm904_vm10, %v901_v44, %v903_v49  ;;  %v1436_v44 = vld [vmem:[%s2706_s6 + $0x78] sm:$0xff] }
 0x437   : > { %907 = vst.msk [vmem:[#allocation6] sm:$0xff] %vm886_vm9, %v905_v50 }
 0x439   : > { %v998_v51 = vpop.permute.xlu1 %997  ;;  %v922_v52 = vpop.permute.xlu0 %921 }
 0x43a   : > { %1000 = vst.msk [vmem:[#allocation6 + $0x38] sm:$0xff] %vm886_vm9, %v998_v51  ;;  %v924_v53 = vsel %vm923_vm11, %v920_v45, %v922_v52  ;;  %v1435_v45 = vld [vmem:[%s2706_s6 + $0x70] sm:$0xff] }
 0x43b   : > { %926 = vst.msk [vmem:[#allocation6 + $0x8] sm:$0xff] %vm886_vm9, %v924_v53 }
 0x43d   : > { %v941_v54 = vpop.permute.xlu0 %940  ;;  %v1018_v63 = vld [vmem:[#allocation6 + $0x28] sm:$0xff] }
 0x43e   : > { %v943_v55 = vsel %vm942_vm12, %v939_v46, %v941_v54  ;;  %v1013_v58 = vld [vmem:[#allocation6] sm:$0xff]  ;;  %v1937_v3 = vpack.c.bf16 %v1018_v63, %v1017_v1  ;;  %v1460_v46 = vld [vmem:[%s2706_s6 + $0x88] sm:$0xff] }
 0x43f   : > { %945 = vst.msk [vmem:[#allocation6 + $0x10] sm:$0xff] %vm886_vm9, %v943_v55 }
 0x441   : > { %v960_v56 = vpop.permute.xlu0 %959  ;;  %v1020_v4 = vld [vmem:[#allocation6 + $0x38] sm:$0xff] }
 0x442   : > { %v961_v57 = vsel %vm502_vm4, %v958_v47, %v960_v56  ;;  %v1014_v59 = vld [vmem:[#allocation6 + $0x8] sm:$0xff] }
 0x443   : > { %963 = vst.msk [vmem:[#allocation6 + $0x18] sm:$0xff] %vm886_vm9, %v961_v57  ;;  %v1929_v60 = vpack.c.bf16 %v1014_v59, %v1013_v58  ;;  %v1459_v47 = vld [vmem:[%s2706_s6 + $0x80] sm:$0xff] }
 0x445   : > { %1930 = vmatprep.subr.bf16.mxu0 %v1929_v60  ;;  %v986_v61 = vpop.permute.xlu0 %985 }
 0x446   : > { %988 = vst.msk [vmem:[#allocation6 + $0x30] sm:$0xff] %vm886_vm9, %v986_v61  ;;  %1932 = vmatpush3.bf16.msra.mxu0 %v1929_v60  ;;  %v1015_v22 = vld [vmem:[#allocation6 + $0x10] sm:$0xff] }
 0x449   : > { %v1010_v23 = vpop.permute.xlu0 %1009 }
 0x44a   : > { %1012 = vst.msk [vmem:[#allocation6 + $0x40] sm:$0xff] %vm886_vm9, %v1010_v23  ;;  %v1016_v62 = vld [vmem:[#allocation6 + $0x18] sm:$0xff] }
 0x44b   : > { %v1933_v0 = vpack.c.bf16 %v1016_v62, %v1015_v22 }
 0x44d   : > { %1934 = vmatprep.subr.bf16.mxu0 %v1933_v0  ;;  %v1019_v2 = vld [vmem:[#allocation6 + $0x30] sm:$0xff] }
 0x44e   : > { %1936 = vmatpush3.bf16.msra.mxu0 %v1933_v0  ;;  %v1941_v6 = vpack.c.bf16 %v1020_v4, %v1019_v2 }
 0x44f   : > { %1938 = vmatprep.subr.bf16.mxu0 %v1937_v3 }
 0x451   : > { %v1021_v7 = vld [vmem:[#allocation6 + $0x40] sm:$0xff] }
 0x452   : > { %1940 = vmatpush3.bf16.msra.mxu0 %v1937_v3 }
 0x453   : > { %1942 = vmatprep.subr.bf16.mxu0 %v1941_v6 }
 0x456   : > { %1944 = vmatpush3.bf16.msra.mxu0 %v1941_v6 }
 0x457   : > { %1850 = vmatprep.subr.mxu0 %v1021_v7 }
 0x45a   : > { %1851 = vmatpush3.msra.mxu0 %v1021_v7 }
 0x45b   : > { %1853 = vmatmul.mubr.msk.f32.vlgmr.msra.gmra.mrb[0].mxu0 %vm661_vm8, %v883_v8  ;;  %1961 = vmatprep.subr.bf16.mxu0 %v2096_v19 }
 0x52e   : > { %v2493_v9 = vpop.f32.mrb[0].mxu0 }
 0x52f   : > { %v1104_v10 = vmax.f32 %v2493_v9, 0.0  ;;  %v2496_v11 = vpop.f32.mrb[1].mxu0 }
 0x530   : > { %v1103_v15 = vmax.f32 %v2496_v11, 0.0 }
 0x531   : > { %1110 = vst.msk [vmem:[#allocation7 + $0x10] sm:$0xff] %vm886_vm9, %v1104_v10 }
 0x532   : > { %1109 = vst.msk [vmem:[#allocation7] sm:$0xff] %vm886_vm9, %v1103_v15 }
 0x538   : > { %v1112_v24 = vld [vmem:[#allocation7 + $0x10] sm:$0xff] }
 0x539   : > { %1117 = vrot.lane.b32.xlu0 %v1112_v24, %s2078_s16  ;;  %v1111_v25 = vld [vmem:[#allocation7] sm:$0xff] }
 0x53a   : > { %1115 = vrot.lane.b32.xlu1 %v1111_v25, %s2078_s16 }
 0x5ab   : > { %v1118_v28 = vpop.permute.xlu0 %1117 }
 0x5ac   : > { %v1124_v29 = vmax.f32 %v1112_v24, %v1118_v28  ;;  %v1116_v30 = vpop.permute.xlu1 %1115  ;;  %v1122_v50 = vmax.f32 %v1104_v10, %v1118_v28 }
 0x5ad   : > { %v1123_v31 = vmax.f32 %v1111_v25, %v1116_v30  ;;  %v1121_v48 = vmax.f32 %v1103_v15, %v1116_v30 }
 0x5ae   : > { %1129 = vrot.lane.b32.xlu0 %v1124_v29, %s2084_s20 }
 0x5af   : > { %1127 = vrot.lane.b32.xlu1 %v1123_v31, %s2084_s20  ;;  %s2091_s20 = smov 124  }
 0x5b2   : > { %1246 = vrot.lane.b32.xlu0 %v1241_v32, %s2090_s11 }
 0x5b3   : > { %1244 = vrot.lane.b32.xlu1 %v1240_v33, %s2090_s11 }
 0x5b6   : > { %1283 = vrot.lane.b32.xlu0 %v1278_v34, %s2091_s20 }
 0x5b7   : > { %1281 = vrot.lane.b32.xlu1 %v1277_v35, %s2091_s20  ;;  %v1225_v35 = vld [vmem:[%s2703_s3 + $0x8] sm:$0xff] }
 0x5b8   : > { %1766 = vmatprep.mubr.msk.f32.mxu0 %vm432_vm6, %v1225_v35 }
 0x5ba   : > { %1320 = vrot.lane.b32.xlu0 %v1315_v36, %s2092_s22 }
 0x5bb   : > { %1318 = vrot.lane.b32.xlu1 %v1314_v37, %s2092_s22 }
 0x5be   : > { %1357 = vrot.lane.b32.xlu0 %v1352_v38, %s2078_s16 }
 0x5bf   : > { %1355 = vrot.lane.b32.xlu1 %v1351_v39, %s2078_s16 }
 0x5c2   : > { %1393 = vrot.lane.b32.xlu0 %v1388_v40, %s2079_s23 }
 0x5c3   : > { %1391 = vrot.lane.b32.xlu1 %v1387_v41, %s2079_s23 }
 0x5c6   : > { %1417 = vrot.lane.b32.xlu0 %v1412_v42, %s2093_s24 }
 0x5c7   : > { %1415 = vrot.lane.b32.xlu1 %v1411_v43, %s2093_s24 }
 0x5ca   : > { %1441 = vrot.lane.b32.xlu0 %v1436_v44, %s2094_s28 }
 0x5cb   : > { %1439 = vrot.lane.b32.xlu1 %v1435_v45, %s2094_s28 }
 0x5ce   : > { %1465 = vrot.lane.b32.xlu0 %v1460_v46, %s2095_s18 }
 0x5cf   : > { %1463 = vrot.lane.b32.xlu1 %v1459_v47, %s2095_s18 }
 0x620   : > { %v1130_v49 = vpop.permute.xlu0 %1129 }
 0x621   : > { %v1128_v51 = vpop.permute.xlu1 %1127  ;;  %v1134_v53 = vmax.f32 %v1122_v50, %v1130_v49 }
 0x622   : > { %v1133_v52 = vmax.f32 %v1121_v48, %v1128_v51 }
 0x624   : > { %1871 = vmatprep.mubr.msk.f32.mxu1 %vm886_vm9, %v1133_v52  ;;  %v1247_v55 = vpop.permute.xlu0 %1246 }
 0x625   : > { %1872 = vmatmul.mubr.msk.f32.vlgmr.msra.gmra.mrb[4].mxu1 %vm886_vm9, %v1134_v53  ;;  %v1245_v54 = vpop.permute.xlu1 %1244  ;;  %v1252_v57 = vmul.f32 0.0, %v1247_v55 }
 0x626   : > { %v1250_v56 = vmul.f32 0.0, %v1245_v54 }
 0x628   : > { %1258 = vrot.lane.b32.xlu1 %v1250_v56, %s2095_s18  ;;  %v1284_v60 = vpop.permute.xlu0 %1283 }
 0x629   : > { %v1282_v58 = vpop.permute.xlu1 %1281  ;;  %v1289_v61 = vmul.f32 0.0, %v1284_v60 }
 0x62a   : > { %v1287_v59 = vmul.f32 0.0, %v1282_v58 }
 0x62c   : > { %1262 = vrot.lane.b32.xlu1 %v1252_v57, %s2095_s18  ;;  %v1321_v62 = vpop.permute.xlu0 %1320 }
 0x62d   : > { %v1319_v23 = vpop.permute.xlu1 %1318  ;;  %v1326_v63 = vmul.f32 0.0, %v1321_v62 }
 0x62e   : > { %v1324_v22 = vmul.f32 0.0, %v1319_v23 }
 0x630   : > { %1295 = vrot.lane.b32.xlu1 %v1287_v59, %s2094_s28  ;;  %v1358_v3 = vpop.permute.xlu0 %1357 }
 0x631   : > { %v1356_v0 = vpop.permute.xlu1 %1355  ;;  %v1363_v2 = vmul.f32 0.0, %v1358_v3 }
 0x632   : > { %v1361_v1 = vmul.f32 0.0, %v1356_v0 }
 0x634   : > { %1299 = vrot.lane.b32.xlu1 %v1289_v61, %s2094_s28  ;;  %v1394_v26 = vpop.permute.xlu0 %1393 }
 0x635   : > { %v1392_v6 = vpop.permute.xlu1 %1391 }
 0x638   : > { %1332 = vrot.lane.b32.xlu1 %v1324_v22, %s2093_s24  ;;  %v1418_v28 = vpop.permute.xlu0 %1417 }
 0x639   : > { %v1416_v8 = vpop.permute.xlu1 %1415 }
 0x63c   : > { %1336 = vrot.lane.b32.xlu1 %v1326_v63, %s2093_s24  ;;  %v1442_v30 = vpop.permute.xlu0 %1441 }
 0x63d   : > { %v1440_v13 = vpop.permute.xlu1 %1439 }
 0x640   : > { %1369 = vrot.lane.b32.xlu1 %v1361_v1, %s2079_s23  ;;  %v1466_v33 = vpop.permute.xlu0 %1465 }
 0x641   : > { %v1464_v18 = vpop.permute.xlu1 %1463 }
 0x644   : > { %1373 = vrot.lane.b32.xlu1 %v1363_v2, %s2079_s23 }
 0x69a   : > { %v1259_v36 = vpop.permute.xlu1 %1258 }
 0x69e   : > { %v1263_v37 = vpop.permute.xlu1 %1262 }
 0x6a2   : > { %v1296_v38 = vpop.permute.xlu1 %1295 }
 0x6a6   : > { %v1300_v39 = vpop.permute.xlu1 %1299 }
 0x6aa   : > { %v1333_v40 = vpop.permute.xlu1 %1332 }
 0x6ae   : > { %v1337_v41 = vpop.permute.xlu1 %1336 }
 0x6b2   : > { %v1370_v42 = vpop.permute.xlu1 %1369 }
 0x6b6   : > { %v1374_v43 = vpop.permute.xlu1 %1373 }
 0x6f8   : > { %v1873_v4 = vpop.f32.mrb[4].mxu1 }
 0x6f9   : > { %1235 = vst.msk [vmem:[#allocation8 + $0x20] sm:$0xff] %vm432_vm6, %v1873_v4  ;;  %1384 = vst.msk [vmem:[#allocation9 + $0x48] sm:$0xff] %vm432_vm6, %v1873_v4  ;;  %v1215_v7 = vpop.f32.mrb[5].mxu1 }
 0x6fa   : > { %1234 = vst.msk [vmem:[#allocation8 + $0x8] sm:$0xff] %vm432_vm6, %v1215_v7  ;;  %1383 = vst.msk [vmem:[#allocation9 + $0x40] sm:$0xff] %vm432_vm6, %v1215_v7 }
 0x700   : > { %v1434_v9 = vld [vmem:[#allocation8 + $0x20] sm:$0xff] }
 0x701   : > { %v1433_v10 = vld [vmem:[#allocation8 + $0x8] sm:$0xff]  ;;  %v1253_v11 = vmul.f32 %v1434_v9, %v1247_v55  ;;  %v1290_v14 = vmul.f32 %v1434_v9, %v1284_v60  ;;  %v1327_v16 = vmul.f32 %v1434_v9, %v1321_v62  ;;  %v1364_v5 = vmul.f32 %v1434_v9, %v1358_v3 }
 0x702   : > { %v1397_v12 = vmul.f32 %v1433_v10, %v1392_v6  ;;  %v1421_v15 = vmul.f32 %v1433_v10, %v1416_v8  ;;  %v1445_v17 = vmul.f32 %v1440_v13, %v1433_v10  ;;  %v1251_v20 = vmul.f32 %v1433_v10, %v1245_v54  ;;  %v1489_v13 = vld [vmem:[#allocation9 + $0x40] sm:$0xff] }
 0x703   : > { %1264 = vrot.lane.b32.xlu0 %v1253_v11, %s2095_s18  ;;  %v1469_v21 = vmul.f32 %v1464_v18, %v1433_v10  ;;  %v1288_v24 = vmul.f32 %v1433_v10, %v1282_v58  ;;  %v1325_v25 = vmul.f32 %v1433_v10, %v1319_v23  ;;  %v1362_v27 = vmul.f32 %v1433_v10, %v1356_v0 }
 0x704   : > { %1401 = vrot.lane.b32.xlu1 %v1397_v12, %s2078_s16  ;;  %v1398_v29 = vmul.f32 %v1434_v9, %v1394_v26  ;;  %v1422_v31 = vmul.f32 %v1434_v9, %v1418_v28  ;;  %v1446_v32 = vmul.f32 %v1442_v30, %v1434_v9  ;;  %v1470_v34 = vmul.f32 %v1466_v33, %v1434_v9  ;;  %v1227_v33 = vld [vmem:[%s2703_s3 + $0x18] sm:$0xff] }
 0x707   : > { %1301 = vrot.lane.b32.xlu0 %v1290_v14, %s2094_s28  ;;  %v1490_v14 = vld [vmem:[#allocation9 + $0x48] sm:$0xff] }
 0x708   : > { %1425 = vrot.lane.b32.xlu1 %v1421_v15, %s2092_s22 }
 0x70b   : > { %1338 = vrot.lane.b32.xlu0 %v1327_v16, %s2093_s24  ;;  %v1974_v16 = vpack.c.bf16 %v1490_v14, %v1489_v13 }
 0x70c   : > { %1449 = vrot.lane.b32.xlu1 %v1445_v17, %s2091_s20 }
 0x70f   : > { %1260 = vrot.lane.b32.xlu0 %v1251_v20, %s2095_s18 }
 0x710   : > { %1473 = vrot.lane.b32.xlu1 %v1469_v21, %s2090_s11 }
 0x713   : > { %1297 = vrot.lane.b32.xlu0 %v1288_v24, %s2094_s28 }
 0x717   : > { %1334 = vrot.lane.b32.xlu0 %v1325_v25, %s2093_s24 }
 0x71b   : > { %1371 = vrot.lane.b32.xlu0 %v1362_v27, %s2079_s23 }
 0x71f   : > { %1375 = vrot.lane.b32.xlu0 %v1364_v5, %s2079_s23 }
 0x723   : > { %1403 = vrot.lane.b32.xlu0 %v1398_v29, %s2078_s16 }
 0x727   : > { %1427 = vrot.lane.b32.xlu0 %v1422_v31, %s2092_s22 }
 0x72b   : > { %1451 = vrot.lane.b32.xlu0 %v1446_v32, %s2091_s20  ;;  %v1224_v32 = vld [vmem:[%s2703_s3] sm:$0xff] }
 0x72f   : > { %1475 = vrot.lane.b32.xlu0 %v1470_v34, %s2090_s11  ;;  %v1226_v34 = vld [vmem:[%s2703_s3 + $0x10] sm:$0xff] }
 0x775   : > { %v1265_v44 = vpop.permute.xlu0 %1264 }
 0x776   : > { %v1268_v45 = vsel %vm1266_vm13, %v1263_v37, %v1265_v44  ;;  %v1402_v46 = vpop.permute.xlu1 %1401 }
 0x777   : > { %1272 = vst.msk [vmem:[#allocation9 + $0x8] sm:$0xff] %vm432_vm6, %v1268_v45  ;;  %1407 = vst.msk [vmem:[#allocation9 + $0x50] sm:$0xff] %vm432_vm6, %v1402_v46 }
 0x779   : > { %v1302_v47 = vpop.permute.xlu0 %1301 }
 0x77a   : > { %v1305_v48 = vsel %vm1303_vm14, %v1300_v39, %v1302_v47  ;;  %v1426_v49 = vpop.permute.xlu1 %1425  ;;  %v1613_v39 = vld [vmem:[%s2709_s9 + $0x8] sm:$0xff] }
 0x77b   : > { %1309 = vst.msk [vmem:[#allocation9 + $0x18] sm:$0xff] %vm432_vm6, %v1305_v48  ;;  %1431 = vst.msk [vmem:[#allocation9 + $0x60] sm:$0xff] %vm432_vm6, %v1426_v49 }
 0x77d   : > { %v1339_v50 = vpop.permute.xlu0 %1338 }
 0x77e   : > { %v1342_v51 = vsel %vm1340_vm15, %v1337_v41, %v1339_v50  ;;  %v1450_v52 = vpop.permute.xlu1 %1449  ;;  %v1482_v61 = vld [vmem:[#allocation9 + $0x8] sm:$0xff]  ;;  %v1491_v20 = vld [vmem:[#allocation9 + $0x50] sm:$0xff] }
 0x77f   : > { %1346 = vst.msk [vmem:[#allocation9 + $0x28] sm:$0xff] %vm432_vm6, %v1342_v51  ;;  %1455 = vst.msk [vmem:[#allocation9 + $0x70] sm:$0xff] %vm432_vm6, %v1450_v52 }
 0x781   : > { %v1261_v53 = vpop.permute.xlu0 %1260 }
 0x782   : > { %v1267_v54 = vsel %vm1266_vm13, %v1259_v36, %v1261_v53  ;;  %v1474_v55 = vpop.permute.xlu1 %1473  ;;  %v1484_v0 = vld [vmem:[#allocation9 + $0x18] sm:$0xff]  ;;  %v1493_v25 = vld [vmem:[#allocation9 + $0x60] sm:$0xff] }
 0x783   : > { %1271 = vst.msk [vmem:[#allocation9] sm:$0xff] %vm432_vm6, %v1267_v54  ;;  %1479 = vst.msk [vmem:[#allocation9 + $0x80] sm:$0xff] %vm432_vm6, %v1474_v55 }
 0x785   : > { %v1298_v56 = vpop.permute.xlu0 %1297 }
 0x786   : > { %v1304_v57 = vsel %vm1303_vm14, %v1296_v38, %v1298_v56  ;;  %v1486_v6 = vld [vmem:[#allocation9 + $0x28] sm:$0xff]  ;;  %v1495_v5 = vld [vmem:[#allocation9 + $0x70] sm:$0xff] }
 0x787   : > { %1308 = vst.msk [vmem:[#allocation9 + $0x10] sm:$0xff] %vm432_vm6, %v1304_v57  ;;  %v1612_v38 = vld [vmem:[%s2709_s9] sm:$0xff] }
 0x789   : > { %v1335_v58 = vpop.permute.xlu0 %1334 }
 0x78a   : > { %v1341_v59 = vsel %vm1340_vm15, %v1333_v40, %v1335_v58  ;;  %v1481_v60 = vld [vmem:[#allocation9] sm:$0xff] }
 0x78b   : > { %1345 = vst.msk [vmem:[#allocation9 + $0x20] sm:$0xff] %vm432_vm6, %v1341_v59  ;;  %v1962_v23 = vpack.c.bf16 %v1482_v61, %v1481_v60  ;;  %v1497_v30 = vld [vmem:[#allocation9 + $0x80] sm:$0xff] }
 0x78d   : > { %1963 = vmatpush1.bf16.msra.mxu0 %v1962_v23  ;;  %v1372_v22 = vpop.permute.xlu0 %1371 }
 0x78e   : > { %v1377_v62 = vsel %vm502_vm4, %v1370_v42, %v1372_v22  ;;  %1964 = vmatprep.subr.bf16.mxu0 %v2096_v19  ;;  %v1483_v63 = vld [vmem:[#allocation9 + $0x10] sm:$0xff]  ;;  %v1988_v42 = vpack.c.bf16 %v1613_v39, %v1612_v38 }
 0x78f   : > { %1381 = vst.msk [vmem:[#allocation9 + $0x30] sm:$0xff] %vm432_vm6, %v1377_v62  ;;  %v1965_v1 = vpack.c.bf16 %v1484_v0, %v1483_v63 }
 0x791   : > { %1966 = vmatpush1.bf16.msra.mxu0 %v1965_v1  ;;  %v1376_v3 = vpop.permute.xlu0 %1375 }
 0x792   : > { %v1378_v2 = vsel %vm502_vm4, %v1374_v43, %v1376_v3  ;;  %1967 = vmatprep.subr.bf16.mxu0 %v2096_v19  ;;  %v1485_v4 = vld [vmem:[#allocation9 + $0x20] sm:$0xff] }
 0x793   : > { %1382 = vst.msk [vmem:[#allocation9 + $0x38] sm:$0xff] %vm432_vm6, %v1378_v2  ;;  %v1968_v7 = vpack.c.bf16 %v1486_v6, %v1485_v4 }
 0x795   : > { %1969 = vmatpush1.bf16.msra.mxu0 %v1968_v7  ;;  %v1404_v8 = vpop.permute.xlu0 %1403 }
 0x796   : > { %1408 = vst.msk [vmem:[#allocation9 + $0x58] sm:$0xff] %vm432_vm6, %v1404_v8  ;;  %1970 = vmatprep.subr.bf16.mxu0 %v2096_v19  ;;  %v1487_v10 = vld [vmem:[#allocation9 + $0x30] sm:$0xff] }
 0x799   : > { %v1428_v9 = vpop.permute.xlu0 %1427 }
 0x79a   : > { %1432 = vst.msk [vmem:[#allocation9 + $0x68] sm:$0xff] %vm432_vm6, %v1428_v9  ;;  %v1488_v11 = vld [vmem:[#allocation9 + $0x38] sm:$0xff] }
 0x79b   : > { %v1971_v12 = vpack.c.bf16 %v1488_v11, %v1487_v10 }
 0x79d   : > { %1972 = vmatpush1.bf16.msra.mxu0 %v1971_v12  ;;  %v1452_v15 = vpop.permute.xlu0 %1451  ;;  %v1492_v17 = vld [vmem:[#allocation9 + $0x58] sm:$0xff] }
 0x79e   : > { %1456 = vst.msk [vmem:[#allocation9 + $0x78] sm:$0xff] %vm432_vm6, %v1452_v15  ;;  %1973 = vmatprep.subr.bf16.mxu0 %v2096_v19  ;;  %v1977_v21 = vpack.c.bf16 %v1492_v17, %v1491_v20 }
 0x7a1   : > { %1975 = vmatpush1.bf16.msra.mxu0 %v1974_v16  ;;  %v1476_v18 = vpop.permute.xlu0 %1475  ;;  %v1494_v24 = vld [vmem:[#allocation9 + $0x68] sm:$0xff] }
 0x7a2   : > { %1480 = vst.msk [vmem:[#allocation9 + $0x88] sm:$0xff] %vm432_vm6, %v1476_v18  ;;  %1976 = vmatprep.subr.bf16.mxu0 %v2096_v19  ;;  %v1980_v26 = vpack.c.bf16 %v1494_v24, %v1493_v25 }
 0x7a5   : > { %1978 = vmatpush1.bf16.msra.mxu0 %v1977_v21  ;;  %v1496_v27 = vld [vmem:[#allocation9 + $0x78] sm:$0xff] }
 0x7a6   : > { %1979 = vmatprep.subr.bf16.mxu0 %v2096_v19  ;;  %v1983_v28 = vpack.c.bf16 %v1496_v27, %v1495_v5 }
 0x7a9   : > { %1981 = vmatpush1.bf16.msra.mxu0 %v1980_v26  ;;  %v1498_v29 = vld [vmem:[#allocation9 + $0x88] sm:$0xff] }
 0x7aa   : > { %1982 = vmatprep.subr.bf16.mxu0 %v2096_v19  ;;  %v1986_v31 = vpack.c.bf16 %v1498_v29, %v1497_v30 }
 0x7ad   : > { %1984 = vmatpush1.bf16.msra.mxu0 %v1983_v28 }
 0x7ae   : > { %1985 = vmatprep.subr.bf16.mxu0 %v2096_v19 }
 0x7b1   : > { %1987 = vmatpush1.bf16.msra.mxu0 %v1986_v31 }
 0x7b2   : > { %1989 = vmatprep.subr.bf16.mxu0 %v1988_v42 }
 0x7b4   : > { %1570 = vmatmul.mubr.f32.vlgmr.msra.gmra.mrb[2].mxu0 %v1224_v32 }
 0x7b5   : > { %1767 = vmatprep.mubr.msk.f32.mxu0 %vm432_vm6, %v1227_v33  ;;  %1991 = vmatpush3.bf16.msra.mxu0 %v1988_v42 }
 0x7b8   : > { %1575 = vmatmul.mubr.f32.gmra.mrb[4].mxu0 %v1226_v34 }
 0x887   : > { %v1571_v19 = vpop.f32.mrb[2].mxu0 }
 0x888   : > { %v1580_v35 = vmax.f32 %v1571_v19, 0.0  ;;  %v1573_v36 = vpop.f32.mrb[3].mxu0 }
 0x88a   : > { %1586 = vst.msk [vmem:[#allocation10] sm:$0xff] %vm432_vm6, %v1580_v35 }
 0x88b   : > { %v1576_v37 = vpop.f32.mrb[4].mxu0 }
 0x88c   : > { %v1581_v40 = vmax.f32 %v1576_v37, 0.0  ;;  %v1578_v41 = vpop.f32.mrb[5].mxu0 }
 0x88e   : > { %1587 = vst.msk [vmem:[#allocation10 + $0x10] sm:$0xff] %vm432_vm6, %v1581_v40 }
 0x891   : > { %v1588_v43 = vld [vmem:[#allocation10] sm:$0xff] }
 0x892   : > { %1592 = vrot.lane.b32.xlu1 %v1588_v43, %s2078_s16 }
 0x895   : > { %v1589_v44 = vld [vmem:[#allocation10 + $0x10] sm:$0xff] }
 0x896   : > { %1594 = vrot.lane.b32.xlu0 %v1589_v44, %s2078_s16 }
 0x904   : > { %v1593_v45 = vpop.permute.xlu1 %1592 }
 0x905   : > { %v1600_v46 = vmax.f32 %v1588_v43, %v1593_v45  ;;  %v1598_v49 = vmax.f32 %v1580_v35, %v1593_v45 }
 0x907   : > { %1604 = vrot.lane.b32.xlu1 %v1600_v46, %s2091_s20 }
 0x908   : > { %v1595_v47 = vpop.permute.xlu0 %1594 }
 0x909   : > { %v1601_v48 = vmax.f32 %v1589_v44, %v1595_v47  ;;  %v1599_v52 = vmax.f32 %v1581_v40, %v1595_v47 }
 0x90b   : > { %1606 = vrot.lane.b32.xlu0 %v1601_v48, %s2091_s20 }
 0x979   : > { %v1605_v50 = vpop.permute.xlu1 %1604 }
 0x97a   : > { %v1610_v51 = vmax.f32 %v1598_v49, %v1605_v50 }
 0x97c   : > { %1878 = vmatprep.mubr.msk.f32.mxu0 %vm432_vm6, %v1610_v51 }
 0x97d   : > { %v1607_v53 = vpop.permute.xlu0 %1606 }
 0x97e   : > { %v1611_v54 = vmax.f32 %v1599_v52, %v1607_v53 }
 0x980   : > { %1879 = vmatmul.mubr.msk.f32.vlgmr.msra.gmra.mrb[6].mxu0 %vm432_vm6, %v1611_v54 }
 0xa53   : > { %v1880_v55 = vpop.f32.mrb[6].mxu0 }
 0xa54   : > { %1696 = vst.msk [vmem:[%s359_s12 + $0x8] sm:$0xff] %vm1303_vm14, %v1880_v55  ;;  %v1686_v56 = vpop.f32.mrb[7].mxu0 }
 0xa55   : > { %1695 = vst.msk [vmem:[%s359_s12] sm:$0xff] %vm1303_vm14, %v1686_v56 }
 0xa56 PF: > { %s20_s13 = sadd.s32 1, %s2073_s13  }
 0xa57   : > { %p17_p4 = scmp.ge.s32.totalorder %s20_s13, 4  }
 0xa59   :  { %19 = sbr.rel (!%p17_p4) target bundleno = 1 (0x1), region = 90 }

</bundles_post_ra>
